<compile_context>
chip_gen: v5e
topology: v5e:2x2
jax: 0.10.0
libtpu: 0.0.40
codegen_flags: <defaults>
</compile_context>

<pallas_src>
import functools

import jax
import jax.numpy as jnp
from jax import lax
from jax.experimental import pallas as pl
from jax.experimental.pallas import tpu as pltpu


EPS = 1e-6


def _layernorm(x, gamma, beta):
    # Two-pass statistics (Var(x - mu)), matching nn.LayerNorm(eps=1e-6) and
    # avoiding the E[x^2]-E[x]^2 cancellation flagged in review.
    mu = jnp.mean(x, axis=-1, keepdims=True)
    xc = x - mu
    var = jnp.mean(xc * xc, axis=-1, keepdims=True)
    return xc * lax.rsqrt(var + EPS) * gamma + beta


def _channel_group(bt, S):
    """How many batch elements are folded per channel-MLP matmul.

    Folding is only layout-free when S % 8 == 0 (sublane-aligned reshape of the
    (g, S, D) slab to (g*S, D)); the group size is capped so the f32 channel
    hidden (rows x C) stays small in VMEM (important on 64-MiB v7x)."""
    if S % 8 != 0:
        return 1
    target_rows = 512
    if S >= target_rows:
        return 1
    return max(1, min(bt, target_rows // S))


def _mixer_block_kernel(x_ref,
                        g1_ref, be1_ref,
                        wt1t_ref, bt1_ref, wt2t_ref, bt2_ref,
                        g2_ref, be2_ref,
                        wc1_ref, bc1_ref, wc2_ref, bc2_ref,
                        o_ref,
                        *, gelu_approx, chan_group):
    Bt, S, D = x_ref.shape

    # Resident weights / norm params: loaded once per grid step.
    g1, be1 = g1_ref[...], be1_ref[...]          # (1, D) f32
    g2, be2 = g2_ref[...], be2_ref[...]          # (1, D) f32
    wt1t, bt1 = wt1t_ref[...], bt1_ref[...]      # (T, S) bf16, (T, 1) f32
    wt2t, bt2 = wt2t_ref[...], bt2_ref[...]      # (S, T) bf16, (S, 1) f32
    wc1, bc1 = wc1_ref[...], bc1_ref[...]        # (D, C) bf16, (1, C) f32
    wc2, bc2 = wc2_ref[...], bc2_ref[...]        # (C, D) bf16, (1, D) f32

    b0 = 0
    while b0 < Bt:                               # static Python loop over groups
        g = min(chan_group, Bt - b0)

        # ---- token-mixing MLP: per-batch-element 2-D matmuls (no broadcast
        #      of the weights, no activation transposes) ----
        mids = []
        for b in range(b0, b0 + g):              # static unroll, Bt is small
            xb = x_ref[b].astype(jnp.float32)                        # (S, D)
            yb = _layernorm(xb, g1, be1).astype(jnp.bfloat16)        # (S, D)
            hb = jnp.dot(wt1t, yb,
                         preferred_element_type=jnp.float32) + bt1   # (T, D)
            hb = jax.nn.gelu(hb, approximate=gelu_approx)
            tb = jnp.dot(wt2t, hb.astype(jnp.bfloat16),
                         preferred_element_type=jnp.float32) + bt2   # (S, D)
            mids.append(xb + tb)                 # residual stream stays f32

        # ---- norm2 + channel MLP on a (g*S, D) slab (layout-free fold) ----
        if g == 1:
            x2 = mids[0]                                             # (S, D)
        else:
            x2 = jnp.concatenate(mids, axis=0)                       # (g*S, D)
        z = _layernorm(x2, g2, be2)
        h2 = jnp.dot(z.astype(jnp.bfloat16), wc1,
                     preferred_element_type=jnp.float32) + bc1
        h2 = jax.nn.gelu(h2, approximate=gelu_approx)
        h2 = jnp.dot(h2.astype(jnp.bfloat16), wc2,
                     preferred_element_type=jnp.float32) + bc2
        out = (x2 + h2).astype(o_ref.dtype)                          # residual

        if g == 1:
            o_ref[b0] = out
        else:
            o_ref[pl.ds(b0, g)] = out.reshape(g, S, D)
        b0 += g


def _vmem_capacity_bytes():
    """Per-core VMEM capacity; conservative (v7x-sized) default on failure."""
    try:
        return int(pltpu.get_tpu_info().vmem_capacity_bytes)
    except Exception:
        return 64 * 2**20


def _pick_batch_tile(B, S, D, C, T, in_itemsize, vmem_limit, weight_bytes, cap):
    """Pick Bt (a divisor of B): fit the real live set in the VMEM budget,
    keep enough grid steps for every TensorCore to pipeline, and prefer
    MXU-friendly (multiple-of-256-ish) flat M for the channel matmuls."""
    # Budget left after (conservatively double-buffered) resident weights and
    # a margin for Mosaic-internal scratch.
    act_budget = max(4 * 2**20, vmem_limit - 2 * weight_bytes - 8 * 2**20)

    two_core = cap <= 64 * 2**20       # v7x-class part: 2 TCs share the grid
    min_steps = 1
    if B >= 2:
        min_steps = 2
    if two_core and B >= 4:
        min_steps = 4                  # >=2 steps per TensorCore for overlap

    def live_bytes(bt):
        f32, bf16 = 4, 2
        g = _channel_group(bt, S)
        rows = g * S
        pipe = 2 * 2 * bt * S * D * in_itemsize        # dbl-buffered x/out tiles
        mids = rows * D * f32                          # residual stream per group
        token = S * D * (2 * f32 + bf16) + T * D * (f32 + bf16)
        chan = (rows * D * (2 * f32 + bf16)            # x2/z + bf16 copy
                + rows * C * (f32 + bf16)              # h2 + bf16 copy
                + rows * D * in_itemsize)              # output slab
        return pipe + mids + max(token, chan)

    best, best_key = 1, None
    for bt in range(1, B + 1):
        if B % bt:
            continue
        if B // bt < min_steps:
            continue
        if live_bytes(bt) > act_budget:
            continue
        m = bt * S
        eff = m / (((m + 255) // 256) * 256)   # M-padding efficiency on 256-tile MXU
        key = (round(eff, 3), 1 if m >= 512 else 0, bt)
        if best_key is None or key > best_key:
            best, best_key = bt, key
    return best


def mixer_block(x, params, *, batch_tile=None, gelu_approx=True):
    """x: (B, S, D). params: dict of f32 weights stored as (in, out) matrices.

    gelu_approx=True uses the tanh GELU (EUP-friendly); set False for exact erf
    to match nn.GELU bit-for-bit at the cost of VALU cycles."""
    B, S, D = x.shape
    T = params["wt1"].shape[1]
    C = params["wc1"].shape[1]

    wdt = jnp.bfloat16  # matmul operand dtype; accumulation stays f32 in-kernel
    # TODO(synk): on v7x, wc1/wc2 could be stored fp8 (e4m3) with per-column
    # scales for ~2x MXU rate on the channel MLP; kept bf16 here for fidelity.
    ops = {
        "g1":   params["g1"].astype(jnp.float32).reshape(1, D),
        "be1":  params["be1"].astype(jnp.float32).reshape(1, D),
        "wt1t": params["wt1"].T.astype(wdt),                     # (T, S)
        "bt1":  params["bt1"].astype(jnp.float32).reshape(T, 1),
        "wt2t": params["wt2"].T.astype(wdt),                     # (S, T)
        "bt2":  params["bt2"].astype(jnp.float32).reshape(S, 1),
        "g2":   params["g2"].astype(jnp.float32).reshape(1, D),
        "be2":  params["be2"].astype(jnp.float32).reshape(1, D),
        "wc1":  params["wc1"].astype(wdt),                       # (D, C)
        "bc1":  params["bc1"].astype(jnp.float32).reshape(1, C),
        "wc2":  params["wc2"].astype(wdt),                       # (C, D)
        "bc2":  params["bc2"].astype(jnp.float32).reshape(1, D),
    }
    order = ("g1", "be1", "wt1t", "bt1", "wt2t", "bt2",
             "g2", "be2", "wc1", "bc1", "wc2", "bc2")
    weights = [ops[k] for k in order]
    weight_bytes = sum(int(w.size) * w.dtype.itemsize for w in weights)

    # Generation-aware VMEM budget: ~0.8 of capacity, capped at 100 MiB on
    # 128-MiB parts (v5e/v6e) and ~51 MiB on 64-MiB parts (v7x).
    cap = _vmem_capacity_bytes()
    vmem_limit = max(32 * 2**20, min(int(cap * 0.8), 100 * 2**20))

    Bt = batch_tile or _pick_batch_tile(B, S, D, C, T, x.dtype.itemsize,
                                        vmem_limit, weight_bytes, cap)
    assert B % Bt == 0, "batch tile must divide batch"
    chan_group = _channel_group(Bt, S)

    kernel = functools.partial(_mixer_block_kernel,
                               gelu_approx=bool(gelu_approx),
                               chan_group=chan_group)

    flops = 4 * B * S * D * (T + C)          # two matmuls each for token & channel MLPs
    transcendentals = B * (T * D + S * C)    # GELU evaluations
    bytes_accessed = 2 * B * S * D * x.dtype.itemsize + weight_bytes

    def build(single_buffer_weights):
        def resident_spec(arr):
            kwargs = {}
            if single_buffer_weights:
                # Constant block index across the grid -> single buffer is
                # enough; halves VMEM reserved for the (large) channel weights.
                kwargs["pipeline_mode"] = pl.Buffered(1)
            return pl.BlockSpec(arr.shape, lambda b: (0, 0), **kwargs)

        return pl.pallas_call(
            kernel,
            out_shape=jax.ShapeDtypeStruct((B, S, D), x.dtype),
            grid=(B // Bt,),
            in_specs=[pl.BlockSpec((Bt, S, D), lambda b: (b, 0, 0))]
                     + [resident_spec(w) for w in weights],
            out_specs=pl.BlockSpec((Bt, S, D), lambda b: (b, 0, 0)),
            compiler_params=pltpu.CompilerParams(
                dimension_semantics=("parallel",),
                vmem_limit_bytes=int(vmem_limit)),
            cost_estimate=pl.CostEstimate(
                flops=flops,
                transcendentals=transcendentals,
                bytes_accessed=bytes_accessed),
        )

    try:
        return build(True)(x, *weights)
    except Exception:
        # Fallback for JAX/Mosaic versions that reject pipeline_mode=Buffered(1).
        return build(False)(x, *weights)


def mixer_block_ref(x, p):
    """Pure-JAX f32 reference matching the PyTorch forward (exact erf GELU)."""
    def layernorm(v, g, b):
        mu = jnp.mean(v, axis=-1, keepdims=True)
        var = jnp.mean((v - mu) ** 2, axis=-1, keepdims=True)
        return (v - mu) * lax.rsqrt(var + EPS) * g + b

    y = layernorm(x, p["g1"], p["be1"])                     # (B,S,D)
    yt = jnp.swapaxes(y, 1, 2)                              # (B,D,S)
    h = jax.nn.gelu(yt @ p["wt1"] + p["bt1"], approximate=False)
    h = h @ p["wt2"] + p["bt2"]
    x = x + jnp.swapaxes(h, 1, 2)

    z = layernorm(x, p["g2"], p["be2"])
    h2 = jax.nn.gelu(z @ p["wc1"] + p["bc1"], approximate=False)
    h2 = h2 @ p["wc2"] + p["bc2"]
    return x + h2


def make_params(key, dim, seq_len, mlp_ratio=(0.5, 4.0), dtype=jnp.float32):
    tokens_dim = int(mlp_ratio[0] * dim)
    channels_dim = int(mlp_ratio[1] * dim)
    ks = jax.random.split(key, 8)
    scale = 0.02
    # Linear weights stored as (in_features, out_features) == torch weight.T
    return {
        "g1":  jnp.ones((1, dim), dtype),
        "be1": jnp.zeros((1, dim), dtype),
        "wt1": scale * jax.random.normal(ks[0], (seq_len, tokens_dim), dtype),
        "bt1": scale * jax.random.normal(ks[1], (1, tokens_dim), dtype),
        "wt2": scale * jax.random.normal(ks[2], (tokens_dim, seq_len), dtype),
        "bt2": scale * jax.random.normal(ks[3], (1, seq_len), dtype),
        "g2":  jnp.ones((1, dim), dtype),
        "be2": jnp.zeros((1, dim), dtype),
        "wc1": scale * jax.random.normal(ks[4], (dim, channels_dim), dtype),
        "bc1": scale * jax.random.normal(ks[5], (1, channels_dim), dtype),
        "wc2": scale * jax.random.normal(ks[6], (channels_dim, dim), dtype),
        "bc2": scale * jax.random.normal(ks[7], (1, dim), dtype),
    }


if __name__ == "__main__":
    B, S, D = 2, 16, 32          # batch, seq_len (tokens), dim (channels)
    key = jax.random.PRNGKey(0)
    kx, kp = jax.random.split(key)
    x = jax.random.normal(kx, (B, S, D), jnp.float32)
    params = make_params(kp, dim=D, seq_len=S)

    out = jax.block_until_ready(mixer_block(x, params))
    ref = mixer_block_ref(x, params)
    assert out.shape == (B, S, D)
    # bf16 matmul operands (f32 accumulation) + tanh-approx GELU vs. the pure
    # f32 exact-erf reference: deviation is O(1e-4) at these magnitudes.
    assert jnp.allclose(out, ref, atol=2e-3, rtol=2e-3), "mismatch vs reference"

    # Second config exercises batch tiling (Bt > 1) and the batch-folded
    # (g*S, D) channel-MLP path.
    B2 = 8
    x2 = jax.random.normal(jax.random.fold_in(kx, 1), (B2, S, D), jnp.float32)
    out2 = jax.block_until_ready(mixer_block(x2, params))
    ref2 = mixer_block_ref(x2, params)
    assert out2.shape == (B2, S, D)
    assert jnp.allclose(out2, ref2, atol=2e-3, rtol=2e-3), "mismatch vs reference (tiled)"

    print("KERNEL_OK")
</pallas_src>

<mosaic_0001>
module attributes {stable_mosaic.version = 11 : i64} {
  func.func @_mixer_block_kernel(%arg0: i32, %arg1: memref<1x16x32xf32, #tpu.memory_space<vmem>>, %arg2: memref<1x32xf32, #tpu.memory_space<vmem>>, %arg3: memref<1x32xf32, #tpu.memory_space<vmem>>, %arg4: memref<16x16xbf16, #tpu.memory_space<vmem>>, %arg5: memref<16x1xf32, #tpu.memory_space<vmem>>, %arg6: memref<16x16xbf16, #tpu.memory_space<vmem>>, %arg7: memref<16x1xf32, #tpu.memory_space<vmem>>, %arg8: memref<1x32xf32, #tpu.memory_space<vmem>>, %arg9: memref<1x32xf32, #tpu.memory_space<vmem>>, %arg10: memref<32x128xbf16, #tpu.memory_space<vmem>>, %arg11: memref<1x128xf32, #tpu.memory_space<vmem>>, %arg12: memref<128x32xbf16, #tpu.memory_space<vmem>>, %arg13: memref<1x32xf32, #tpu.memory_space<vmem>>, %arg14: memref<1x16x32xf32, #tpu.memory_space<vmem>>) attributes {dimension_semantics = [#tpu.dimension_semantics<parallel>], iteration_bounds = array<i64: 2>, scalar_prefetch = 0 : i64, scratch_operands = 0 : i64, tpu.core_type = #tpu.core_type<tc>, window_params = [{transform_indices = @transform_0, window_bounds = array<i64: 1, 16, 32>}, {pipeline_mode = #tpu.pipeline_mode<synchronous>, transform_indices = @transform_1, window_bounds = array<i64: 1, 32>}, {pipeline_mode = #tpu.pipeline_mode<synchronous>, transform_indices = @transform_2, window_bounds = array<i64: 1, 32>}, {pipeline_mode = #tpu.pipeline_mode<synchronous>, transform_indices = @transform_3, window_bounds = array<i64: 16, 16>}, {pipeline_mode = #tpu.pipeline_mode<synchronous>, transform_indices = @transform_4, window_bounds = array<i64: 16, 1>}, {pipeline_mode = #tpu.pipeline_mode<synchronous>, transform_indices = @transform_5, window_bounds = array<i64: 16, 16>}, {pipeline_mode = #tpu.pipeline_mode<synchronous>, transform_indices = @transform_6, window_bounds = array<i64: 16, 1>}, {pipeline_mode = #tpu.pipeline_mode<synchronous>, transform_indices = @transform_7, window_bounds = array<i64: 1, 32>}, {pipeline_mode = #tpu.pipeline_mode<synchronous>, transform_indices = @transform_8, window_bounds = array<i64: 1, 32>}, {pipeline_mode = #tpu.pipeline_mode<synchronous>, transform_indices = @transform_9, window_bounds = array<i64: 32, 128>}, {pipeline_mode = #tpu.pipeline_mode<synchronous>, transform_indices = @transform_10, window_bounds = array<i64: 1, 128>}, {pipeline_mode = #tpu.pipeline_mode<synchronous>, transform_indices = @transform_11, window_bounds = array<i64: 128, 32>}, {pipeline_mode = #tpu.pipeline_mode<synchronous>, transform_indices = @transform_12, window_bounds = array<i64: 1, 32>}, {transform_indices = @transform_13, window_bounds = array<i64: 1, 16, 32>}]} {
    %c0 = arith.constant 0 : index
    %c0_0 = arith.constant 0 : index
    %0 = vector.load %arg2[%c0, %c0_0] : memref<1x32xf32, #tpu.memory_space<vmem>>, vector<1x32xf32>
    %c0_1 = arith.constant 0 : index
    %c0_2 = arith.constant 0 : index
    %1 = vector.load %arg3[%c0_1, %c0_2] : memref<1x32xf32, #tpu.memory_space<vmem>>, vector<1x32xf32>
    %c0_3 = arith.constant 0 : index
    %c0_4 = arith.constant 0 : index
    %2 = vector.load %arg8[%c0_3, %c0_4] : memref<1x32xf32, #tpu.memory_space<vmem>>, vector<1x32xf32>
    %c0_5 = arith.constant 0 : index
    %c0_6 = arith.constant 0 : index
    %3 = vector.load %arg9[%c0_5, %c0_6] : memref<1x32xf32, #tpu.memory_space<vmem>>, vector<1x32xf32>
    %c0_7 = arith.constant 0 : index
    %c0_8 = arith.constant 0 : index
    %4 = vector.load %arg4[%c0_7, %c0_8] : memref<16x16xbf16, #tpu.memory_space<vmem>>, vector<16x16xbf16>
    %c0_9 = arith.constant 0 : index
    %c0_10 = arith.constant 0 : index
    %5 = vector.load %arg5[%c0_9, %c0_10] : memref<16x1xf32, #tpu.memory_space<vmem>>, vector<16x1xf32>
    %c0_11 = arith.constant 0 : index
    %c0_12 = arith.constant 0 : index
    %6 = vector.load %arg6[%c0_11, %c0_12] : memref<16x16xbf16, #tpu.memory_space<vmem>>, vector<16x16xbf16>
    %c0_13 = arith.constant 0 : index
    %c0_14 = arith.constant 0 : index
    %7 = vector.load %arg7[%c0_13, %c0_14] : memref<16x1xf32, #tpu.memory_space<vmem>>, vector<16x1xf32>
    %c0_15 = arith.constant 0 : index
    %c0_16 = arith.constant 0 : index
    %8 = vector.load %arg10[%c0_15, %c0_16] : memref<32x128xbf16, #tpu.memory_space<vmem>>, vector<32x128xbf16>
    %c0_17 = arith.constant 0 : index
    %c0_18 = arith.constant 0 : index
    %9 = vector.load %arg11[%c0_17, %c0_18] : memref<1x128xf32, #tpu.memory_space<vmem>>, vector<1x128xf32>
    %c0_19 = arith.constant 0 : index
    %c0_20 = arith.constant 0 : index
    %10 = vector.load %arg12[%c0_19, %c0_20] : memref<128x32xbf16, #tpu.memory_space<vmem>>, vector<128x32xbf16>
    %c0_21 = arith.constant 0 : index
    %c0_22 = arith.constant 0 : index
    %11 = vector.load %arg13[%c0_21, %c0_22] : memref<1x32xf32, #tpu.memory_space<vmem>>, vector<1x32xf32>
    %c0_23 = arith.constant 0 : index
    %c0_24 = arith.constant 0 : index
    %c0_25 = arith.constant 0 : index
    %12 = vector.load %arg1[%c0_23, %c0_24, %c0_25] : memref<1x16x32xf32, #tpu.memory_space<vmem>>, vector<1x16x32xf32>
    %13 = vector.shape_cast %12 : vector<1x16x32xf32> to vector<16x32xf32>
    %cst = arith.constant dense<0.000000e+00> : vector<16xf32>
    %14 = vector.multi_reduction <add>, %13, %cst [1] : vector<16x32xf32> to vector<16xf32>
    %15 = vector.shape_cast %14 : vector<16xf32> to vector<16x1xf32>
    %cst_26 = arith.constant 3.200000e+01 : f32
    %16 = vector.broadcast %cst_26 : f32 to vector<16x1xf32>
    %17 = arith.divf %15, %16 : vector<16x1xf32>
    %18 = vector.broadcast %17 : vector<16x1xf32> to vector<16x32xf32>
    %19 = arith.subf %13, %18 : vector<16x32xf32>
    %20 = arith.mulf %19, %19 : vector<16x32xf32>
    %cst_27 = arith.constant dense<0.000000e+00> : vector<16xf32>
    %21 = vector.multi_reduction <add>, %20, %cst_27 [1] : vector<16x32xf32> to vector<16xf32>
    %22 = vector.shape_cast %21 : vector<16xf32> to vector<16x1xf32>
    %cst_28 = arith.constant 3.200000e+01 : f32
    %23 = vector.broadcast %cst_28 : f32 to vector<16x1xf32>
    %24 = arith.divf %22, %23 : vector<16x1xf32>
    %cst_29 = arith.constant 9.99999997E-7 : f32
    %25 = vector.broadcast %cst_29 : f32 to vector<16x1xf32>
    %26 = arith.addf %24, %25 : vector<16x1xf32>
    %27 = math.rsqrt %26 : vector<16x1xf32>
    %28 = vector.broadcast %27 : vector<16x1xf32> to vector<16x32xf32>
    %29 = arith.mulf %19, %28 : vector<16x32xf32>
    %30 = vector.broadcast %0 : vector<1x32xf32> to vector<16x32xf32>
    %31 = arith.mulf %29, %30 : vector<16x32xf32>
    %32 = vector.broadcast %1 : vector<1x32xf32> to vector<16x32xf32>
    %33 = arith.addf %31, %32 : vector<16x32xf32>
    %34 = arith.truncf %33 : vector<16x32xf32> to vector<16x32xbf16>
    %cst_30 = arith.constant dense<0.000000e+00> : vector<16x32xf32>
    %35 = tpu.matmul %4, %34, %cst_30 {dimension_numbers = #tpu.dot_dimension_numbers<[1], [0], [0], [1], [0, 0, 1, 1], [], []>} : vector<16x16xbf16>, vector<16x32xbf16>, vector<16x32xf32> -> vector<16x32xf32>
    %36 = vector.broadcast %5 : vector<16x1xf32> to vector<16x32xf32>
    %37 = arith.addf %35, %36 : vector<16x32xf32>
    %38 = arith.mulf %37, %37 : vector<16x32xf32>
    %39 = arith.mulf %37, %38 : vector<16x32xf32>
    %cst_31 = arith.constant 4.471500e-02 : f32
    %40 = vector.broadcast %cst_31 : f32 to vector<16x32xf32>
    %41 = arith.mulf %40, %39 : vector<16x32xf32>
    %42 = arith.addf %37, %41 : vector<16x32xf32>
    %cst_32 = arith.constant 0.797884583 : f32
    %43 = vector.broadcast %cst_32 : f32 to vector<16x32xf32>
    %44 = arith.mulf %43, %42 : vector<16x32xf32>
    %45 = math.tanh %44 : vector<16x32xf32>
    %cst_33 = arith.constant 1.000000e+00 : f32
    %46 = vector.broadcast %cst_33 : f32 to vector<16x32xf32>
    %47 = arith.addf %46, %45 : vector<16x32xf32>
    %cst_34 = arith.constant 5.000000e-01 : f32
    %48 = vector.broadcast %cst_34 : f32 to vector<16x32xf32>
    %49 = arith.mulf %48, %47 : vector<16x32xf32>
    %50 = arith.mulf %37, %49 : vector<16x32xf32>
    %51 = arith.truncf %50 : vector<16x32xf32> to vector<16x32xbf16>
    %cst_35 = arith.constant dense<0.000000e+00> : vector<16x32xf32>
    %52 = tpu.matmul %6, %51, %cst_35 {dimension_numbers = #tpu.dot_dimension_numbers<[1], [0], [0], [1], [0, 0, 1, 1], [], []>} : vector<16x16xbf16>, vector<16x32xbf16>, vector<16x32xf32> -> vector<16x32xf32>
    %53 = vector.broadcast %7 : vector<16x1xf32> to vector<16x32xf32>
    %54 = arith.addf %52, %53 : vector<16x32xf32>
    %55 = arith.addf %13, %54 : vector<16x32xf32>
    %cst_36 = arith.constant dense<0.000000e+00> : vector<16xf32>
    %56 = vector.multi_reduction <add>, %55, %cst_36 [1] : vector<16x32xf32> to vector<16xf32>
    %57 = vector.shape_cast %56 : vector<16xf32> to vector<16x1xf32>
    %cst_37 = arith.constant 3.200000e+01 : f32
    %58 = vector.broadcast %cst_37 : f32 to vector<16x1xf32>
    %59 = arith.divf %57, %58 : vector<16x1xf32>
    %60 = vector.broadcast %59 : vector<16x1xf32> to vector<16x32xf32>
    %61 = arith.subf %55, %60 : vector<16x32xf32>
    %62 = arith.mulf %61, %61 : vector<16x32xf32>
    %cst_38 = arith.constant dense<0.000000e+00> : vector<16xf32>
    %63 = vector.multi_reduction <add>, %62, %cst_38 [1] : vector<16x32xf32> to vector<16xf32>
    %64 = vector.shape_cast %63 : vector<16xf32> to vector<16x1xf32>
    %cst_39 = arith.constant 3.200000e+01 : f32
    %65 = vector.broadcast %cst_39 : f32 to vector<16x1xf32>
    %66 = arith.divf %64, %65 : vector<16x1xf32>
    %cst_40 = arith.constant 9.99999997E-7 : f32
    %67 = vector.broadcast %cst_40 : f32 to vector<16x1xf32>
    %68 = arith.addf %66, %67 : vector<16x1xf32>
    %69 = math.rsqrt %68 : vector<16x1xf32>
    %70 = vector.broadcast %69 : vector<16x1xf32> to vector<16x32xf32>
    %71 = arith.mulf %61, %70 : vector<16x32xf32>
    %72 = vector.broadcast %2 : vector<1x32xf32> to vector<16x32xf32>
    %73 = arith.mulf %71, %72 : vector<16x32xf32>
    %74 = vector.broadcast %3 : vector<1x32xf32> to vector<16x32xf32>
    %75 = arith.addf %73, %74 : vector<16x32xf32>
    %76 = arith.truncf %75 : vector<16x32xf32> to vector<16x32xbf16>
    %cst_41 = arith.constant dense<0.000000e+00> : vector<16x128xf32>
    %77 = tpu.matmul %76, %8, %cst_41 {dimension_numbers = #tpu.dot_dimension_numbers<[1], [0], [0], [1], [0, 0, 1, 1], [], []>} : vector<16x32xbf16>, vector<32x128xbf16>, vector<16x128xf32> -> vector<16x128xf32>
    %78 = vector.broadcast %9 : vector<1x128xf32> to vector<16x128xf32>
    %79 = arith.addf %77, %78 : vector<16x128xf32>
    %80 = arith.mulf %79, %79 : vector<16x128xf32>
    %81 = arith.mulf %79, %80 : vector<16x128xf32>
    %cst_42 = arith.constant 4.471500e-02 : f32
    %82 = vector.broadcast %cst_42 : f32 to vector<16x128xf32>
    %83 = arith.mulf %82, %81 : vector<16x128xf32>
    %84 = arith.addf %79, %83 : vector<16x128xf32>
    %cst_43 = arith.constant 0.797884583 : f32
    %85 = vector.broadcast %cst_43 : f32 to vector<16x128xf32>
    %86 = arith.mulf %85, %84 : vector<16x128xf32>
    %87 = math.tanh %86 : vector<16x128xf32>
    %cst_44 = arith.constant 1.000000e+00 : f32
    %88 = vector.broadcast %cst_44 : f32 to vector<16x128xf32>
    %89 = arith.addf %88, %87 : vector<16x128xf32>
    %cst_45 = arith.constant 5.000000e-01 : f32
    %90 = vector.broadcast %cst_45 : f32 to vector<16x128xf32>
    %91 = arith.mulf %90, %89 : vector<16x128xf32>
    %92 = arith.mulf %79, %91 : vector<16x128xf32>
    %93 = arith.truncf %92 : vector<16x128xf32> to vector<16x128xbf16>
    %cst_46 = arith.constant dense<0.000000e+00> : vector<16x32xf32>
    %94 = tpu.matmul %93, %10, %cst_46 {dimension_numbers = #tpu.dot_dimension_numbers<[1], [0], [0], [1], [0, 0, 1, 1], [], []>} : vector<16x128xbf16>, vector<128x32xbf16>, vector<16x32xf32> -> vector<16x32xf32>
    %95 = vector.broadcast %11 : vector<1x32xf32> to vector<16x32xf32>
    %96 = arith.addf %94, %95 : vector<16x32xf32>
    %97 = arith.addf %55, %96 : vector<16x32xf32>
    %c0_47 = arith.constant 0 : index
    %c0_48 = arith.constant 0 : index
    %c0_49 = arith.constant 0 : index
    %98 = vector.load %arg14[%c0_47, %c0_48, %c0_49] : memref<1x16x32xf32, #tpu.memory_space<vmem>>, vector<1x16x32xf32>
    %99 = vector.shape_cast %98 : vector<1x16x32xf32> to vector<16x32xf32>
    %100 = vector.shape_cast %97 : vector<16x32xf32> to vector<1x16x32xf32>
    tpu.vector_store %arg14[%c0_47, %c0_48, %c0_49], %100 {strides = array<i32>} : memref<1x16x32xf32, #tpu.memory_space<vmem>>, vector<1x16x32xf32>,
    return
  }
  func.func @transform_0(%arg0: i32) -> (i32, i32, i32) {
    %c0_i32 = arith.constant 0 : i32
    %c0_i32_0 = arith.constant 0 : i32
    %c0_i32_1 = arith.constant 0 : i32
    return %arg0, %c0_i32, %c0_i32_0 : i32, i32, i32
  }
  func.func @transform_1(%arg0: i32) -> (i32, i32) {
    %c0_i32 = arith.constant 0 : i32
    %c0_i32_0 = arith.constant 0 : i32
    %c0_i32_1 = arith.constant 0 : i32
    return %c0_i32, %c0_i32_0 : i32, i32
  }
  func.func @transform_2(%arg0: i32) -> (i32, i32) {
    %c0_i32 = arith.constant 0 : i32
    %c0_i32_0 = arith.constant 0 : i32
    %c0_i32_1 = arith.constant 0 : i32
    return %c0_i32, %c0_i32_0 : i32, i32
  }
  func.func @transform_3(%arg0: i32) -> (i32, i32) {
    %c0_i32 = arith.constant 0 : i32
    %c0_i32_0 = arith.constant 0 : i32
    %c0_i32_1 = arith.constant 0 : i32
    return %c0_i32, %c0_i32_0 : i32, i32
  }
  func.func @transform_4(%arg0: i32) -> (i32, i32) {
    %c0_i32 = arith.constant 0 : i32
    %c0_i32_0 = arith.constant 0 : i32
    %c0_i32_1 = arith.constant 0 : i32
    return %c0_i32, %c0_i32_0 : i32, i32
  }
  func.func @transform_5(%arg0: i32) -> (i32, i32) {
    %c0_i32 = arith.constant 0 : i32
    %c0_i32_0 = arith.constant 0 : i32
    %c0_i32_1 = arith.constant 0 : i32
    return %c0_i32, %c0_i32_0 : i32, i32
  }
  func.func @transform_6(%arg0: i32) -> (i32, i32) {
    %c0_i32 = arith.constant 0 : i32
    %c0_i32_0 = arith.constant 0 : i32
    %c0_i32_1 = arith.constant 0 : i32
    return %c0_i32, %c0_i32_0 : i32, i32
  }
  func.func @transform_7(%arg0: i32) -> (i32, i32) {
    %c0_i32 = arith.constant 0 : i32
    %c0_i32_0 = arith.constant 0 : i32
    %c0_i32_1 = arith.constant 0 : i32
    return %c0_i32, %c0_i32_0 : i32, i32
  }
  func.func @transform_8(%arg0: i32) -> (i32, i32) {
    %c0_i32 = arith.constant 0 : i32
    %c0_i32_0 = arith.constant 0 : i32
    %c0_i32_1 = arith.constant 0 : i32
    return %c0_i32, %c0_i32_0 : i32, i32
  }
  func.func @transform_9(%arg0: i32) -> (i32, i32) {
    %c0_i32 = arith.constant 0 : i32
    %c0_i32_0 = arith.constant 0 : i32
    %c0_i32_1 = arith.constant 0 : i32
    return %c0_i32, %c0_i32_0 : i32, i32
  }
  func.func @transform_10(%arg0: i32) -> (i32, i32) {
    %c0_i32 = arith.constant 0 : i32
    %c0_i32_0 = arith.constant 0 : i32
    %c0_i32_1 = arith.constant 0 : i32
    return %c0_i32, %c0_i32_0 : i32, i32
  }
  func.func @transform_11(%arg0: i32) -> (i32, i32) {
    %c0_i32 = arith.constant 0 : i32
    %c0_i32_0 = arith.constant 0 : i32
    %c0_i32_1 = arith.constant 0 : i32
    return %c0_i32, %c0_i32_0 : i32, i32
  }
  func.func @transform_12(%arg0: i32) -> (i32, i32) {
    %c0_i32 = arith.constant 0 : i32
    %c0_i32_0 = arith.constant 0 : i32
    %c0_i32_1 = arith.constant 0 : i32
    return %c0_i32, %c0_i32_0 : i32, i32
  }
  func.func @transform_13(%arg0: i32) -> (i32, i32, i32) {
    %c0_i32 = arith.constant 0 : i32
    %c0_i32_0 = arith.constant 0 : i32
    %c0_i32_1 = arith.constant 0 : i32
    return %arg0, %c0_i32, %c0_i32_0 : i32, i32, i32
  }
}

module attributes {stable_mosaic.version = 11 : i64} {
  func.func @_mixer_block_kernel(%arg0: i32, %arg1: memref<1x16x32xf32, #tpu.memory_space<vmem>>, %arg2: memref<1x32xf32, #tpu.memory_space<vmem>>, %arg3: memref<1x32xf32, #tpu.memory_space<vmem>>, %arg4: memref<16x16xbf16, #tpu.memory_space<vmem>>, %arg5: memref<16x1xf32, #tpu.memory_space<vmem>>, %arg6: memref<16x16xbf16, #tpu.memory_space<vmem>>, %arg7: memref<16x1xf32, #tpu.memory_space<vmem>>, %arg8: memref<1x32xf32, #tpu.memory_space<vmem>>, %arg9: memref<1x32xf32, #tpu.memory_space<vmem>>, %arg10: memref<32x128xbf16, #tpu.memory_space<vmem>>, %arg11: memref<1x128xf32, #tpu.memory_space<vmem>>, %arg12: memref<128x32xbf16, #tpu.memory_space<vmem>>, %arg13: memref<1x32xf32, #tpu.memory_space<vmem>>, %arg14: memref<1x16x32xf32, #tpu.memory_space<vmem>>) attributes {dimension_semantics = [#tpu.dimension_semantics<parallel>], iteration_bounds = array<i64: 2>, scalar_prefetch = 0 : i64, scratch_operands = 0 : i64, tpu.core_type = #tpu.core_type<tc>, window_params = [{transform_indices = @transform_0, window_bounds = array<i64: 1, 16, 32>}, {pipeline_mode = #tpu.pipeline_mode<synchronous>, transform_indices = @transform_1, window_bounds = array<i64: 1, 32>}, {pipeline_mode = #tpu.pipeline_mode<synchronous>, transform_indices = @transform_2, window_bounds = array<i64: 1, 32>}, {pipeline_mode = #tpu.pipeline_mode<synchronous>, transform_indices = @transform_3, window_bounds = array<i64: 16, 16>}, {pipeline_mode = #tpu.pipeline_mode<synchronous>, transform_indices = @transform_4, window_bounds = array<i64: 16, 1>}, {pipeline_mode = #tpu.pipeline_mode<synchronous>, transform_indices = @transform_5, window_bounds = array<i64: 16, 16>}, {pipeline_mode = #tpu.pipeline_mode<synchronous>, transform_indices = @transform_6, window_bounds = array<i64: 16, 1>}, {pipeline_mode = #tpu.pipeline_mode<synchronous>, transform_indices = @transform_7, window_bounds = array<i64: 1, 32>}, {pipeline_mode = #tpu.pipeline_mode<synchronous>, transform_indices = @transform_8, window_bounds = array<i64: 1, 32>}, {pipeline_mode = #tpu.pipeline_mode<synchronous>, transform_indices = @transform_9, window_bounds = array<i64: 32, 128>}, {pipeline_mode = #tpu.pipeline_mode<synchronous>, transform_indices = @transform_10, window_bounds = array<i64: 1, 128>}, {pipeline_mode = #tpu.pipeline_mode<synchronous>, transform_indices = @transform_11, window_bounds = array<i64: 128, 32>}, {pipeline_mode = #tpu.pipeline_mode<synchronous>, transform_indices = @transform_12, window_bounds = array<i64: 1, 32>}, {transform_indices = @transform_13, window_bounds = array<i64: 1, 16, 32>}]} {
    %c0 = arith.constant 0 : index
    %c0_0 = arith.constant 0 : index
    %0 = vector.load %arg2[%c0, %c0_0] : memref<1x32xf32, #tpu.memory_space<vmem>>, vector<1x32xf32>
    %c0_1 = arith.constant 0 : index
    %c0_2 = arith.constant 0 : index
    %1 = vector.load %arg3[%c0_1, %c0_2] : memref<1x32xf32, #tpu.memory_space<vmem>>, vector<1x32xf32>
    %c0_3 = arith.constant 0 : index
    %c0_4 = arith.constant 0 : index
    %2 = vector.load %arg8[%c0_3, %c0_4] : memref<1x32xf32, #tpu.memory_space<vmem>>, vector<1x32xf32>
    %c0_5 = arith.constant 0 : index
    %c0_6 = arith.constant 0 : index
    %3 = vector.load %arg9[%c0_5, %c0_6] : memref<1x32xf32, #tpu.memory_space<vmem>>, vector<1x32xf32>
    %c0_7 = arith.constant 0 : index
    %c0_8 = arith.constant 0 : index
    %4 = vector.load %arg4[%c0_7, %c0_8] : memref<16x16xbf16, #tpu.memory_space<vmem>>, vector<16x16xbf16>
    %c0_9 = arith.constant 0 : index
    %c0_10 = arith.constant 0 : index
    %5 = vector.load %arg5[%c0_9, %c0_10] : memref<16x1xf32, #tpu.memory_space<vmem>>, vector<16x1xf32>
    %c0_11 = arith.constant 0 : index
    %c0_12 = arith.constant 0 : index
    %6 = vector.load %arg6[%c0_11, %c0_12] : memref<16x16xbf16, #tpu.memory_space<vmem>>, vector<16x16xbf16>
    %c0_13 = arith.constant 0 : index
    %c0_14 = arith.constant 0 : index
    %7 = vector.load %arg7[%c0_13, %c0_14] : memref<16x1xf32, #tpu.memory_space<vmem>>, vector<16x1xf32>
    %c0_15 = arith.constant 0 : index
    %c0_16 = arith.constant 0 : index
    %8 = vector.load %arg10[%c0_15, %c0_16] : memref<32x128xbf16, #tpu.memory_space<vmem>>, vector<32x128xbf16>
    %c0_17 = arith.constant 0 : index
    %c0_18 = arith.constant 0 : index
    %9 = vector.load %arg11[%c0_17, %c0_18] : memref<1x128xf32, #tpu.memory_space<vmem>>, vector<1x128xf32>
    %c0_19 = arith.constant 0 : index
    %c0_20 = arith.constant 0 : index
    %10 = vector.load %arg12[%c0_19, %c0_20] : memref<128x32xbf16, #tpu.memory_space<vmem>>, vector<128x32xbf16>
    %c0_21 = arith.constant 0 : index
    %c0_22 = arith.constant 0 : index
    %11 = vector.load %arg13[%c0_21, %c0_22] : memref<1x32xf32, #tpu.memory_space<vmem>>, vector<1x32xf32>
    %c0_23 = arith.constant 0 : index
    %c0_24 = arith.constant 0 : index
    %c0_25 = arith.constant 0 : index
    %12 = vector.load %arg1[%c0_23, %c0_24, %c0_25] : memref<1x16x32xf32, #tpu.memory_space<vmem>>, vector<1x16x32xf32>
    %13 = vector.shape_cast %12 : vector<1x16x32xf32> to vector<16x32xf32>
    %cst = arith.constant dense<0.000000e+00> : vector<16xf32>
    %14 = vector.multi_reduction <add>, %13, %cst [1] : vector<16x32xf32> to vector<16xf32>
    %15 = vector.shape_cast %14 : vector<16xf32> to vector<16x1xf32>
    %cst_26 = arith.constant 3.200000e+01 : f32
    %16 = vector.broadcast %cst_26 : f32 to vector<16x1xf32>
    %17 = arith.divf %15, %16 : vector<16x1xf32>
    %18 = vector.broadcast %17 : vector<16x1xf32> to vector<16x32xf32>
    %19 = arith.subf %13, %18 : vector<16x32xf32>
    %20 = arith.mulf %19, %19 : vector<16x32xf32>
    %cst_27 = arith.constant dense<0.000000e+00> : vector<16xf32>
    %21 = vector.multi_reduction <add>, %20, %cst_27 [1] : vector<16x32xf32> to vector<16xf32>
    %22 = vector.shape_cast %21 : vector<16xf32> to vector<16x1xf32>
    %cst_28 = arith.constant 3.200000e+01 : f32
    %23 = vector.broadcast %cst_28 : f32 to vector<16x1xf32>
    %24 = arith.divf %22, %23 : vector<16x1xf32>
    %cst_29 = arith.constant 9.99999997E-7 : f32
    %25 = vector.broadcast %cst_29 : f32 to vector<16x1xf32>
    %26 = arith.addf %24, %25 : vector<16x1xf32>
    %27 = math.rsqrt %26 : vector<16x1xf32>
    %28 = vector.broadcast %27 : vector<16x1xf32> to vector<16x32xf32>
    %29 = arith.mulf %19, %28 : vector<16x32xf32>
    %30 = vector.broadcast %0 : vector<1x32xf32> to vector<16x32xf32>
    %31 = arith.mulf %29, %30 : vector<16x32xf32>
    %32 = vector.broadcast %1 : vector<1x32xf32> to vector<16x32xf32>
    %33 = arith.addf %31, %32 : vector<16x32xf32>
    %34 = arith.truncf %33 : vector<16x32xf32> to vector<16x32xbf16>
    %cst_30 = arith.constant dense<0.000000e+00> : vector<16x32xf32>
    %35 = tpu.matmul %4, %34, %cst_30 {dimension_numbers = #tpu.dot_dimension_numbers<[1], [0], [0], [1], [0, 0, 1, 1], [], []>} : vector<16x16xbf16>, vector<16x32xbf16>, vector<16x32xf32> -> vector<16x32xf32>
    %36 = vector.broadcast %5 : vector<16x1xf32> to vector<16x32xf32>
    %37 = arith.addf %35, %36 : vector<16x32xf32>
    %38 = arith.mulf %37, %37 : vector<16x32xf32>
    %39 = arith.mulf %37, %38 : vector<16x32xf32>
    %cst_31 = arith.constant 4.471500e-02 : f32
    %40 = vector.broadcast %cst_31 : f32 to vector<16x32xf32>
    %41 = arith.mulf %40, %39 : vector<16x32xf32>
    %42 = arith.addf %37, %41 : vector<16x32xf32>
    %cst_32 = arith.constant 0.797884583 : f32
    %43 = vector.broadcast %cst_32 : f32 to vector<16x32xf32>
    %44 = arith.mulf %43, %42 : vector<16x32xf32>
    %45 = math.tanh %44 : vector<16x32xf32>
    %cst_33 = arith.constant 1.000000e+00 : f32
    %46 = vector.broadcast %cst_33 : f32 to vector<16x32xf32>
    %47 = arith.addf %46, %45 : vector<16x32xf32>
    %cst_34 = arith.constant 5.000000e-01 : f32
    %48 = vector.broadcast %cst_34 : f32 to vector<16x32xf32>
    %49 = arith.mulf %48, %47 : vector<16x32xf32>
    %50 = arith.mulf %37, %49 : vector<16x32xf32>
    %51 = arith.truncf %50 : vector<16x32xf32> to vector<16x32xbf16>
    %cst_35 = arith.constant dense<0.000000e+00> : vector<16x32xf32>
    %52 = tpu.matmul %6, %51, %cst_35 {dimension_numbers = #tpu.dot_dimension_numbers<[1], [0], [0], [1], [0, 0, 1, 1], [], []>} : vector<16x16xbf16>, vector<16x32xbf16>, vector<16x32xf32> -> vector<16x32xf32>
    %53 = vector.broadcast %7 : vector<16x1xf32> to vector<16x32xf32>
    %54 = arith.addf %52, %53 : vector<16x32xf32>
    %55 = arith.addf %13, %54 : vector<16x32xf32>
    %cst_36 = arith.constant dense<0.000000e+00> : vector<16xf32>
    %56 = vector.multi_reduction <add>, %55, %cst_36 [1] : vector<16x32xf32> to vector<16xf32>
    %57 = vector.shape_cast %56 : vector<16xf32> to vector<16x1xf32>
    %cst_37 = arith.constant 3.200000e+01 : f32
    %58 = vector.broadcast %cst_37 : f32 to vector<16x1xf32>
    %59 = arith.divf %57, %58 : vector<16x1xf32>
    %60 = vector.broadcast %59 : vector<16x1xf32> to vector<16x32xf32>
    %61 = arith.subf %55, %60 : vector<16x32xf32>
    %62 = arith.mulf %61, %61 : vector<16x32xf32>
    %cst_38 = arith.constant dense<0.000000e+00> : vector<16xf32>
    %63 = vector.multi_reduction <add>, %62, %cst_38 [1] : vector<16x32xf32> to vector<16xf32>
    %64 = vector.shape_cast %63 : vector<16xf32> to vector<16x1xf32>
    %cst_39 = arith.constant 3.200000e+01 : f32
    %65 = vector.broadcast %cst_39 : f32 to vector<16x1xf32>
    %66 = arith.divf %64, %65 : vector<16x1xf32>
    %cst_40 = arith.constant 9.99999997E-7 : f32
    %67 = vector.broadcast %cst_40 : f32 to vector<16x1xf32>
    %68 = arith.addf %66, %67 : vector<16x1xf32>
    %69 = math.rsqrt %68 : vector<16x1xf32>
    %70 = vector.broadcast %69 : vector<16x1xf32> to vector<16x32xf32>
    %71 = arith.mulf %61, %70 : vector<16x32xf32>
    %72 = vector.broadcast %2 : vector<1x32xf32> to vector<16x32xf32>
    %73 = arith.mulf %71, %72 : vector<16x32xf32>
    %74 = vector.broadcast %3 : vector<1x32xf32> to vector<16x32xf32>
    %75 = arith.addf %73, %74 : vector<16x32xf32>
    %76 = arith.truncf %75 : vector<16x32xf32> to vector<16x32xbf16>
    %cst_41 = arith.constant dense<0.000000e+00> : vector<16x128xf32>
    %77 = tpu.matmul %76, %8, %cst_41 {dimension_numbers = #tpu.dot_dimension_numbers<[1], [0], [0], [1], [0, 0, 1, 1], [], []>} : vector<16x32xbf16>, vector<32x128xbf16>, vector<16x128xf32> -> vector<16x128xf32>
    %78 = vector.broadcast %9 : vector<1x128xf32> to vector<16x128xf32>
    %79 = arith.addf %77, %78 : vector<16x128xf32>
    %80 = arith.mulf %79, %79 : vector<16x128xf32>
    %81 = arith.mulf %79, %80 : vector<16x128xf32>
    %cst_42 = arith.constant 4.471500e-02 : f32
    %82 = vector.broadcast %cst_42 : f32 to vector<16x128xf32>
    %83 = arith.mulf %82, %81 : vector<16x128xf32>
    %84 = arith.addf %79, %83 : vector<16x128xf32>
    %cst_43 = arith.constant 0.797884583 : f32
    %85 = vector.broadcast %cst_43 : f32 to vector<16x128xf32>
    %86 = arith.mulf %85, %84 : vector<16x128xf32>
    %87 = math.tanh %86 : vector<16x128xf32>
    %cst_44 = arith.constant 1.000000e+00 : f32
    %88 = vector.broadcast %cst_44 : f32 to vector<16x128xf32>
    %89 = arith.addf %88, %87 : vector<16x128xf32>
    %cst_45 = arith.constant 5.000000e-01 : f32
    %90 = vector.broadcast %cst_45 : f32 to vector<16x128xf32>
    %91 = arith.mulf %90, %89 : vector<16x128xf32>
    %92 = arith.mulf %79, %91 : vector<16x128xf32>
    %93 = arith.truncf %92 : vector<16x128xf32> to vector<16x128xbf16>
    %cst_46 = arith.constant dense<0.000000e+00> : vector<16x32xf32>
    %94 = tpu.matmul %93, %10, %cst_46 {dimension_numbers = #tpu.dot_dimension_numbers<[1], [0], [0], [1], [0, 0, 1, 1], [], []>} : vector<16x128xbf16>, vector<128x32xbf16>, vector<16x32xf32> -> vector<16x32xf32>
    %95 = vector.broadcast %11 : vector<1x32xf32> to vector<16x32xf32>
    %96 = arith.addf %94, %95 : vector<16x32xf32>
    %97 = arith.addf %55, %96 : vector<16x32xf32>
    %c0_47 = arith.constant 0 : index
    %c0_48 = arith.constant 0 : index
    %c0_49 = arith.constant 0 : index
    %98 = vector.load %arg14[%c0_47, %c0_48, %c0_49] : memref<1x16x32xf32, #tpu.memory_space<vmem>>, vector<1x16x32xf32>
    %99 = vector.shape_cast %98 : vector<1x16x32xf32> to vector<16x32xf32>
    %100 = vector.shape_cast %97 : vector<16x32xf32> to vector<1x16x32xf32>
    tpu.vector_store %arg14[%c0_47, %c0_48, %c0_49], %100 {strides = array<i32>} : memref<1x16x32xf32, #tpu.memory_space<vmem>>, vector<1x16x32xf32>,
    return
  }
  func.func @transform_0(%arg0: i32) -> (i32, i32, i32) {
    %c0_i32 = arith.constant 0 : i32
    %c0_i32_0 = arith.constant 0 : i32
    %c0_i32_1 = arith.constant 0 : i32
    return %arg0, %c0_i32, %c0_i32_0 : i32, i32, i32
  }
  func.func @transform_1(%arg0: i32) -> (i32, i32) {
    %c0_i32 = arith.constant 0 : i32
    %c0_i32_0 = arith.constant 0 : i32
    %c0_i32_1 = arith.constant 0 : i32
    return %c0_i32, %c0_i32_0 : i32, i32
  }
  func.func @transform_2(%arg0: i32) -> (i32, i32) {
    %c0_i32 = arith.constant 0 : i32
    %c0_i32_0 = arith.constant 0 : i32
    %c0_i32_1 = arith.constant 0 : i32
    return %c0_i32, %c0_i32_0 : i32, i32
  }
  func.func @transform_3(%arg0: i32) -> (i32, i32) {
    %c0_i32 = arith.constant 0 : i32
    %c0_i32_0 = arith.constant 0 : i32
    %c0_i32_1 = arith.constant 0 : i32
    return %c0_i32, %c0_i32_0 : i32, i32
  }
  func.func @transform_4(%arg0: i32) -> (i32, i32) {
    %c0_i32 = arith.constant 0 : i32
    %c0_i32_0 = arith.constant 0 : i32
    %c0_i32_1 = arith.constant 0 : i32
    return %c0_i32, %c0_i32_0 : i32, i32
  }
  func.func @transform_5(%arg0: i32) -> (i32, i32) {
    %c0_i32 = arith.constant 0 : i32
    %c0_i32_0 = arith.constant 0 : i32
    %c0_i32_1 = arith.constant 0 : i32
    return %c0_i32, %c0_i32_0 : i32, i32
  }
  func.func @transform_6(%arg0: i32) -> (i32, i32) {
    %c0_i32 = arith.constant 0 : i32
    %c0_i32_0 = arith.constant 0 : i32
    %c0_i32_1 = arith.constant 0 : i32
    return %c0_i32, %c0_i32_0 : i32, i32
  }
  func.func @transform_7(%arg0: i32) -> (i32, i32) {
    %c0_i32 = arith.constant 0 : i32
    %c0_i32_0 = arith.constant 0 : i32
    %c0_i32_1 = arith.constant 0 : i32
    return %c0_i32, %c0_i32_0 : i32, i32
  }
  func.func @transform_8(%arg0: i32) -> (i32, i32) {
    %c0_i32 = arith.constant 0 : i32
    %c0_i32_0 = arith.constant 0 : i32
    %c0_i32_1 = arith.constant 0 : i32
    return %c0_i32, %c0_i32_0 : i32, i32
  }
  func.func @transform_9(%arg0: i32) -> (i32, i32) {
    %c0_i32 = arith.constant 0 : i32
    %c0_i32_0 = arith.constant 0 : i32
    %c0_i32_1 = arith.constant 0 : i32
    return %c0_i32, %c0_i32_0 : i32, i32
  }
  func.func @transform_10(%arg0: i32) -> (i32, i32) {
    %c0_i32 = arith.constant 0 : i32
    %c0_i32_0 = arith.constant 0 : i32
    %c0_i32_1 = arith.constant 0 : i32
    return %c0_i32, %c0_i32_0 : i32, i32
  }
  func.func @transform_11(%arg0: i32) -> (i32, i32) {
    %c0_i32 = arith.constant 0 : i32
    %c0_i32_0 = arith.constant 0 : i32
    %c0_i32_1 = arith.constant 0 : i32
    return %c0_i32, %c0_i32_0 : i32, i32
  }
  func.func @transform_12(%arg0: i32) -> (i32, i32) {
    %c0_i32 = arith.constant 0 : i32
    %c0_i32_0 = arith.constant 0 : i32
    %c0_i32_1 = arith.constant 0 : i32
    return %c0_i32, %c0_i32_0 : i32, i32
  }
  func.func @transform_13(%arg0: i32) -> (i32, i32, i32) {
    %c0_i32 = arith.constant 0 : i32
    %c0_i32_0 = arith.constant 0 : i32
    %c0_i32_1 = arith.constant 0 : i32
    return %arg0, %c0_i32, %c0_i32_0 : i32, i32, i32
  }
}

</mosaic_0001>

<bundles_post_ra>
// kernel: tpu_custom_call.1
= control target key start
LH: loop header
LB: loop body
LE: loop exit
PB: predicated region body
PF: predicated region fallthrough
CT: control target
= control target key end

     0   :  { %s1357_s0 = inlined_call_operand.vmem [shape: f32[2,16,32], index: 0, kind: input, shape index: {}]   ;;  %s1358_s1 = inlined_call_operand.vmem [shape: f32[1,32], index: 1, kind: input, shape index: {}]   ;;  %s1359_s2 = inlined_call_operand.vmem [shape: f32[1,32], index: 2, kind: input, shape index: {}]   ;;  %s1360_s3 = inlined_call_operand.vmem [shape: bf16[16,16], index: 3, kind: input, shape index: {}]   ;;  %s1361_s4 = inlined_call_operand.vmem [shape: f32[16,1], index: 4, kind: input, shape index: {}]   ;;  %s1362_s5 = inlined_call_operand.vmem [shape: bf16[16,16], index: 5, kind: input, shape index: {}]   ;;  %s1363_s6 = inlined_call_operand.vmem [shape: f32[16,1], index: 6, kind: input, shape index: {}]   ;;  %s1364_s7 = inlined_call_operand.vmem [shape: f32[1,32], index: 7, kind: input, shape index: {}]   ;;  %s1365_s8 = inlined_call_operand.vmem [shape: f32[1,32], index: 8, kind: input, shape index: {}]   ;;  %s1366_s9 = inlined_call_operand.vmem [shape: bf16[32,128], index: 9, kind: input, shape index: {}]   ;;  %s1367_s10 = inlined_call_operand.vmem [shape: f32[1,128], index: 10, kind: input, shape index: {}]   ;;  %s1368_s11 = inlined_call_operand.vmem [shape: bf16[128,32], index: 11, kind: input, shape index: {}]   ;;  %s1369_s12 = inlined_call_operand.vmem [shape: f32[1,32], index: 12, kind: input, shape index: {}]   ;;  %s1370_s13 = inlined_call_operand.hbm [shape: f32[2,16,32], index: 13, kind: output, shape index: {}]  }
   0x1   :  { %1371 = sst [smem:[#allocation5_spill]] %s1357_s0 }
   0x2   :  { %1372 = sst [smem:[#allocation6_spill]] %s1358_s1 }
   0x3   :  { %1373 = sst [smem:[#allocation7_spill]] %s1359_s2 }
   0x4   :  { %18 = vsyncpa [#allocation3], 0 }
   0x5   :  { %20 = vsyncpa [#allocation3 + $0x1], 0  ;;  %s1163_s25 = smov 0   ;;  %s1165_s26 = smov 0  }
   0x6   :  { %s1167_s27 = smov 0   ;;  %s1169_s28 = smov 0  }
   0x7 LB: > { %s1184_s29 = sadd.s32 4294967295, %s1087_s28   ;;  %s878_s30 = sadd.s32 4294967294, %s1087_s28   ;;  %s1087_s28 = sphi %s1169_s28, %s1382_s28   ;;  %s1083_s27 = sphi %s1167_s27, %s1381_s27   ;;  %s1079_s26 = sphi %s1165_s26, %s1380_s26   ;;  %s1075_s25 = sphi %s1163_s25, %s1379_s25  }
   0x8   : > { %s1188_s14 = sadd.s32 1, %s1087_s28   ;;  %s311_s15 = sadd.s32 1, %s1083_s27 }
   0x9   : > { %s308_s16 = ssub.s32 %s1087_s28, %s1188_s14  ;;  %p321_p0 = scmp.ne.s32.totalorder %s1083_s27, %s1079_s26 }
   0xa   : > { %p309_p1 = scmp.eq.s32.totalorder %s308_s16, 0  ;;  %p322_p2 = scmp.eq.s32.totalorder %s1184_s29, 1 }
   0xb   : > { %p327_p3 = scmp.ne.s32.totalorder %s1079_s26, %s1075_s25  ;;  %p328_p4 = scmp.eq.s32.totalorder %s878_s30, 1 }
   0xc   : > { %s1199_s17 = scalar_select %p309_p1, %s1083_s27, %s311_s15  }
   0xd   : > { %p1201_p5 = por %p322_p2, %p321_p0  ;;  %p1205_p6 = por %p328_p4, %p327_p3 }
   0xe   : > { %p881_p7 = scmp.ge.s32.totalorder %s1087_s28, 1  ;;  %p390_p8 = scmp.lt.s32.totalorder %s1087_s28, 3 }
  0x10   : > { %p391_p9 = pnand %p881_p7, %p390_p8 }
  0x11   : > { %p434_p10 = scmp.lt.s32.totalorder (!%p391_p9), %s1184_s29, 1  ;;  %s1376_s0 = sld [smem:[#allocation5_spill]] (!%p391_p9) }
  0x12   : > { %394 = sbr.rel (%p391_p9) target bundleno = 1196 (0x4ac), region = 72  ;;  %s1377_s1 = sld [smem:[#allocation6_spill]] (!%p391_p9) }
  0x13   : > { %s1378_s2 = sld [smem:[#allocation7_spill]] (!%p391_p9)  ;;  %s954_s16 = sshll.u32 (!%p391_p9), %s1184_s29, 4 }
  0x14   : > { %s812_s22 = scalar_lea.hbm (!%p391_p9), %s1370_s13, %s954_s16 }
  0x17   : > { %s435_s20 = scalar_select %p434_p10, %s1184_s29, 1  ;;  %vm476_vm0 = vcmask 261120   ;;  %v1089_v4 = vmov 32.0   ;;  %v446_v26 = vld [vmem:[%s1361_s4] sm:$0xff]  ;;  %v1090_v29 = vmov 0   ;;  %v447_v33 = vld [vmem:[%s1361_s4 + $0x8] sm:$0xff] }
  0x18   : > { %1007 = vrcp.f32 %v1089_v4  ;;  %998 = vset.pattern.permute.xlu2 %v1090_v29  ;;  %999 = vset.pattern.permute.xlu0 %v1090_v29  ;;  %v1001_v43 = vld [vmem:[%s1377_s1] ss:$0 sm:$0xff]  ;;  %vm554_vm8 = vcmask 130048   ;;  %v451_v61 = vld [vmem:[%s1363_s6 + $0x8] sm:$0xff] }
  0x19   : > { %s941_s21 = sshll.u32 %s435_s20, 4  ;;  %541 = vperm.xlu2 %998, %v446_v26   ;;  %1000 = vset.pattern.permute.xlu1 %v1090_v29  ;;  %v1002_v48 = vld [vmem:[%s1378_s2] ss:$0 sm:$0xff]  ;;  %s815_s2 = sshll.u32 %s812_s22, 4  ;;  %s816_s2 = int_to_ptr.hbm [resolvable:$true] %s815_s2 }
  0x1a   : > { %s438_s24 = scalar_lea.vmem %s1376_s0, %s941_s21  ;;  %v942_v53 = vld [vmem:[%s1360_s3] sm:$0xff]  ;;  %s431_s0 = sand.u32 1, %s1079_s26  }
  0x1b   : > { %v1216_v0 = vld [vmem:[%s438_s24] sm:$0xff]  ;;  %v1220_v2 = vld [vmem:[%s438_s24 + $0x8] sm:$0xff]  ;;  %s882_s15 = sshll.u32 %s431_s0, 4  ;;  %s801_s29 = scalar_lea.sflag [#allocation3], %s431_s0 }
  0x1c   : > { %v477_v1 = vsel %vm476_vm0, %v1216_v0, 0.0  ;;  %v480_v3 = vsel %vm476_vm0, %v1220_v2, 0.0  ;;  %v450_v60 = vld [vmem:[%s1363_s6] sm:$0xff]  ;;  %s433_s23 = scalar_lea.vmem [#allocation2], %s882_s15  ;;  %s1039_s1 = sshra.s32 %s816_s2, 4  ;;  %s1040_s1 = int_to_ptr.hbm [resolvable:$true] %s1039_s1 }
  0x1d   : > { %478 = vadd.xlane.f32.xlu0 %v477_v1  ;;  %s813_s24 = sshll.u32 %s433_s23, 4  ;;  %s1041_s30 = scalar_lea.hbm %s1040_s1, 16  ;;  %s814_s24 = int_to_ptr.vmem [resolvable:$true] %s813_s24 }
  0x1e   : > { %v1008_v5 = vpop.eup %1007  ;;  %p1042_p11 = scmp.ne.s32.totalorder %s1040_s1, %s1041_s30  ;;  %s1045_s20 = scalar_lea.hbm %s1370_s13, 32 }
  0x1f   : > { %v484_v6 = vmul.f32 32.0, %v1008_v5  ;;  %vm488_vm1 = vweird.f32 %v1008_v5  ;;  %p1046_p0 = scmp.lt.s32.totalorder %s1040_s1, %s1370_s13  ;;  %p1047_p1 = scmp.lt.s32.totalorder %s1045_s20, %s1041_s30 }
  0x20   : > { %p1043_p12 = pnand %p1042_p11, %p1201_p5 }
  0x21   : > { %v485_v7 = vsub.f32 1.0, %v484_v6  ;;  %546 = vperm.xlu2 %998, %v447_v33   ;;  %p1048_p2 = por %p1047_p1, %p1046_p0 }
  0x22   : > { %p1044_p13 = pneg %p1043_p12 }
  0x23   : > { %v486_v8 = vmul.f32 %v1008_v5, %v485_v7 }
  0x24   : > { %p1049_p3 = pnand %p1048_p2, %p1044_p13 }
  0x25   : > { %481 = vadd.xlane.f32.xlu0 %v480_v3  ;;  %v487_v9 = vadd.f32 %v1008_v5, %v486_v8 }
  0x27   : > { %v1224_v10 = vsel %vm488_vm1, %v1008_v5, %v487_v9 }
  0x39   : > { %593 = vperm.xlu0 %999, %v450_v60  }
  0x73   : > { %v542_v54 = vpop.permute.xlu2 %541 }
  0x7b   : > { %v547_v62 = vpop.permute.xlu2 %546 }
  0x90   : > { %v479_v11 = vpop.xlane.xlu0 %478 }
  0x91   : > { %v490_v12 = vmul.f32 %v1224_v10, %v479_v11 }
  0x93   : > { %v492_v13 = vsub.f32 %v1216_v0, %v490_v12 }
  0x95   : > { %v494_v14 = vmul.f32 %v492_v13, %v492_v13 }
  0x97   : > { %v496_v15 = vsel %vm476_vm0, %v494_v14, 0.0 }
  0x98   : > { %497 = vadd.xlane.f32.xlu1 %v496_v15  ;;  %v482_v16 = vpop.xlane.xlu0 %481 }
  0x99   : > { %v491_v17 = vmul.f32 %v1224_v10, %v482_v16 }
  0x9b   : > { %v493_v18 = vsub.f32 %v1220_v2, %v491_v17 }
  0x9d   : > { %v495_v19 = vmul.f32 %v493_v18, %v493_v18 }
  0x9f   : > { %v499_v20 = vsel %vm476_vm0, %v495_v19, 0.0 }
  0xa0   : > { %500 = vadd.xlane.f32.xlu1 %v499_v20  ;;  %v943_v20 = vld [vmem:[%s1362_s5] sm:$0xff] }
  0xb9   : > { %598 = vperm.xlu1 %1000, %v451_v61  }
 0x10b   : > { %v498_v21 = vpop.xlane.xlu1 %497 }
 0x10c   : > { %v502_v22 = vmul.f32 %v498_v21, %v1224_v10  ;;  %v594_v21 = vpop.permute.xlu0 %593 }
 0x10e   : > { %v504_v23 = vadd.f32 1e-06, %v502_v22 }
 0x110   : > { %1009 = vrsqrt.f32 %v504_v23  ;;  %vm512_vm3 = vweird.f32 %v504_v23 }
 0x113   : > { %v501_v24 = vpop.xlane.xlu1 %500 }
 0x114   : > { %v503_v25 = vmul.f32 %v501_v24, %v1224_v10 }
 0x116   : > { %v1010_v27 = vpop.eup %1009  ;;  %v505_v28 = vadd.f32 1e-06, %v503_v25 }
 0x117   : > { %v507_v30 = vmul.f32 %v1010_v27, %v504_v23  ;;  %vm513_vm2 = vweird.f32 %v1010_v27 }
 0x118   : > { %1011 = vrsqrt.f32 %v505_v28  ;;  %vm514_vm4 = vmor %vm512_vm3, %vm513_vm2  ;;  %vm522_vm6 = vweird.f32 %v505_v28 }
 0x119   : > { %v508_v31 = vmul.f32 %v1010_v27, %v507_v30 }
 0x11b   : > { %v509_v32 = vmul.f32 0.5, %v508_v31 }
 0x11d   : > { %v510_v34 = vsub.f32 1.5, %v509_v32 }
 0x11e   : > { %v1012_v35 = vpop.eup %1011 }
 0x11f   : > { %v511_v36 = vmul.f32 %v1010_v27, %v510_v34  ;;  %v517_v37 = vmul.f32 %v1012_v35, %v505_v28  ;;  %vm523_vm5 = vweird.f32 %v1012_v35 }
 0x120   : > { %vm524_vm7 = vmor %vm522_vm6, %vm523_vm5 }
 0x121   : > { %v518_v38 = vmul.f32 %v1012_v35, %v517_v37  ;;  %v515_v40 = vsel %vm514_vm4, %v1010_v27, %v511_v36 }
 0x122   : > { %v526_v42 = vmul.f32 %v515_v40, %v492_v13 }
 0x123   : > { %v519_v39 = vmul.f32 0.5, %v518_v38 }
 0x124   : > { %v531_v47 = vmul.f32 %v1001_v43, %v526_v42 }
 0x125   : > { %v520_v41 = vsub.f32 1.5, %v519_v39  ;;  %v945_v39 = vld [vmem:[%s1366_s9 + $0x8] sm:$0xff] }
 0x126   : > { %v536_v50 = vadd.f32 %v1002_v48, %v531_v47  ;;  %704 = vmatpush.bf16.msra.mxu2 %v945_v39 }
 0x127   : > { %v521_v44 = vmul.f32 %v1012_v35, %v520_v41  ;;  %v944_v41 = vld [vmem:[%s1366_s9] sm:$0xff] }
 0x129   : > { %v525_v45 = vsel %vm524_vm7, %v1012_v35, %v521_v44 }
 0x12a   : > { %v527_v46 = vmul.f32 %v525_v45, %v493_v18  ;;  %705 = vmatpush.bf16.msra.mxu2 %v944_v41 }
 0x12b   : > { %v599_v26 = vpop.permute.xlu1 %598 }
 0x12c   : > { %v532_v49 = vmul.f32 %v1001_v43, %v527_v46 }
 0x12e   : > { %v537_v51 = vadd.f32 %v1002_v48, %v532_v49 }
 0x130   : > { %v538_v52 = vpack.c.bf16 %v537_v51, %v536_v50 }
 0x132   : > { %565 = vmatpush.bf16.msra.mxu0 %v538_v52 }
 0x135   : > { %889 = vmatmul.msk.bf16.vlgmr.msra.gmra.mxu0 %vm554_vm8, %v942_v53 }
 0x1b2   : > { %v567_v55 = vpop.f32.mrf.mxu0 }
 0x1b3   : > { %v568_v56 = vadd.f32 %v567_v55, %v542_v54 }
 0x1b5   : > { %v572_v57 = vmul.f32 %v568_v56, %v568_v56 }
 0x1b7   : > { %v574_v58 = vmul.f32 %v572_v57, %v568_v56 }
 0x1b9   : > { %v576_v59 = vmul.f32 0.044715, %v574_v58 }
 0x1ba   : > { %v569_v63 = vpop.f32.mrf.mxu0 }
 0x1bb   : > { %v570_v1 = vadd.f32 %v569_v63, %v547_v62  ;;  %v578_v3 = vadd.f32 %v576_v59, %v568_v56 }
 0x1bd   : > { %v573_v4 = vmul.f32 %v570_v1, %v570_v1  ;;  %v580_v5 = vmul.f32 0.7978846, %v578_v3 }
 0x1bf   : > { %v575_v6 = vmul.f32 %v573_v4, %v570_v1  ;;  %1013 = vtanh.f32 %v580_v5 }
 0x1c1   : > { %v577_v7 = vmul.f32 0.044715, %v575_v6 }
 0x1c3   : > { %v579_v8 = vadd.f32 %v577_v7, %v570_v1  ;;  %v953_v7 = vld [vmem:[%s1368_s11 + $0x38] sm:$0xff] }
 0x1c4   : > { %782 = vmatpush.bf16.msra.mxu3 %v953_v7 }
 0x1c5   : > { %v581_v9 = vmul.f32 0.7978846, %v579_v8  ;;  %v1014_v11 = vpop.eup %1013  ;;  %v952_v8 = vld [vmem:[%s1368_s11 + $0x30] sm:$0xff] }
 0x1c6   : > { %v584_v12 = vadd.f32 1.0, %v1014_v11  ;;  %v950_v11 = vld [vmem:[%s1368_s11 + $0x20] sm:$0xff] }
 0x1c7   : > { %1015 = vtanh.f32 %v581_v9  ;;  %v951_v9 = vld [vmem:[%s1368_s11 + $0x28] sm:$0xff] }
 0x1c8   : > { %v586_v15 = vmul.f32 0.5, %v584_v12  ;;  %783 = vmatpush.bf16.msra.mxu3 %v952_v8  ;;  %v949_v12 = vld [vmem:[%s1368_s11 + $0x18] sm:$0xff] }
 0x1ca   : > { %v588_v17 = vmul.f32 %v586_v15, %v568_v56  ;;  %v1005_v15 = vld [vmem:[%s1367_s10] ss:$0 sm:$0xff] }
 0x1cc   : > { %784 = vmatpush.bf16.msra.mxu3 %v951_v9 }
 0x1cd   : > { %v1016_v13 = vpop.eup %1015 }
 0x1ce   : > { %v585_v14 = vadd.f32 1.0, %v1016_v13  ;;  %v948_v13 = vld [vmem:[%s1368_s11 + $0x10] sm:$0xff] }
 0x1d0   : > { %v587_v16 = vmul.f32 0.5, %v585_v14  ;;  %785 = vmatpush.bf16.msra.mxu3 %v950_v11  ;;  %v947_v14 = vld [vmem:[%s1368_s11 + $0x8] sm:$0xff] }
 0x1d2   : > { %v589_v18 = vmul.f32 %v587_v16, %v570_v1  ;;  %v1004_v1 = vld [vmem:[%s1365_s8] ss:$0 sm:$0xff] }
 0x1d3   : > { %v946_v16 = vld [vmem:[%s1368_s11] sm:$0xff] }
 0x1d4   : > { %v590_v19 = vpack.c.bf16 %v589_v18, %v588_v17  ;;  %786 = vmatpush.bf16.msra.mxu3 %v949_v12 }
 0x1d6   : > { %616 = vmatpush.bf16.msra.mxu1 %v590_v19 }
 0x1d8   : > { %787 = vmatpush.bf16.msra.mxu3 %v948_v13 }
 0x1d9   : > { %894 = vmatmul.msk.bf16.vlgmr.msra.gmra.mxu1 %vm554_vm8, %v943_v20 }
 0x1dc   : > { %788 = vmatpush.bf16.msra.mxu3 %v947_v14 }
 0x1e0   : > { %789 = vmatpush.bf16.msra.mxu3 %v946_v16 }
 0x256   : > { %v618_v22 = vpop.f32.mrf.mxu1 }
 0x257   : > { %v619_v23 = vadd.f32 %v618_v22, %v594_v21 }
 0x259   : > { %v1261_v24 = vadd.f32 %v619_v23, %v1216_v0 }
 0x25b   : > { %v625_v25 = vsel %vm476_vm0, %v1261_v24, 0.0 }
 0x25c   : > { %626 = vadd.xlane.f32.xlu2 %v625_v25 }
 0x25e   : > { %v620_v27 = vpop.f32.mrf.mxu1 }
 0x25f   : > { %v621_v28 = vadd.f32 %v620_v27, %v599_v26 }
 0x261   : > { %v1266_v29 = vadd.f32 %v621_v28, %v1220_v2 }
 0x263   : > { %v628_v30 = vsel %vm476_vm0, %v1266_v29, 0.0 }
 0x264   : > { %629 = vadd.xlane.f32.xlu1 %v628_v30 }
 0x2cf   : > { %v627_v31 = vpop.xlane.xlu2 %626 }
 0x2d0   : > { %v631_v32 = vmul.f32 %v627_v31, %v1224_v10 }
 0x2d2   : > { %v633_v0 = vsub.f32 %v1261_v24, %v631_v32 }
 0x2d4   : > { %v635_v33 = vmul.f32 %v633_v0, %v633_v0 }
 0x2d6   : > { %v637_v34 = vsel %vm476_vm0, %v635_v33, 0.0 }
 0x2d7   : > { %v630_v35 = vpop.xlane.xlu1 %629  ;;  %638 = vadd.xlane.f32.xlu0 %v637_v34 }
 0x2d8   : > { %v632_v36 = vmul.f32 %v630_v35, %v1224_v10 }
 0x2da   : > { %v634_v37 = vsub.f32 %v1266_v29, %v632_v36 }
 0x2dc   : > { %v636_v2 = vmul.f32 %v634_v37, %v634_v37 }
 0x2de   : > { %v640_v38 = vsel %vm476_vm0, %v636_v2, 0.0 }
 0x2df   : > { %641 = vadd.xlane.f32.xlu2 %v640_v38 }
 0x34a   : > { %v639_v40 = vpop.xlane.xlu0 %638 }
 0x34b   : > { %v643_v42 = vmul.f32 %v639_v40, %v1224_v10  ;;  %v1006_v40 = vld [vmem:[%s1369_s12] ss:$0 sm:$0xff] }
 0x34d   : > { %v645_v43 = vadd.f32 1e-06, %v643_v42 }
 0x34f   : > { %1017 = vrsqrt.f32 %v645_v43  ;;  %vm653_vm10 = vweird.f32 %v645_v43 }
 0x352   : > { %v642_v44 = vpop.xlane.xlu2 %641 }
 0x353   : > { %v644_v45 = vmul.f32 %v642_v44, %v1224_v10  ;;  %v1003_v10 = vld [vmem:[%s1364_s7] ss:$0 sm:$0xff] }
 0x355   : > { %v1018_v46 = vpop.eup %1017  ;;  %v646_v47 = vadd.f32 1e-06, %v644_v45 }
 0x356   : > { %v648_v48 = vmul.f32 %v1018_v46, %v645_v43  ;;  %vm654_vm9 = vweird.f32 %v1018_v46 }
 0x357   : > { %1019 = vrsqrt.f32 %v646_v47  ;;  %vm655_vm11 = vmor %vm653_vm10, %vm654_vm9  ;;  %vm663_vm13 = vweird.f32 %v646_v47 }
 0x358   : > { %v649_v49 = vmul.f32 %v1018_v46, %v648_v48 }
 0x35a   : > { %v650_v50 = vmul.f32 0.5, %v649_v49 }
 0x35c   : > { %v651_v51 = vsub.f32 1.5, %v650_v50 }
 0x35d   : > { %v1020_v52 = vpop.eup %1019 }
 0x35e   : > { %v652_v53 = vmul.f32 %v1018_v46, %v651_v51  ;;  %v658_v54 = vmul.f32 %v1020_v52, %v646_v47  ;;  %vm664_vm12 = vweird.f32 %v1020_v52 }
 0x35f   : > { %vm665_vm14 = vmor %vm663_vm13, %vm664_vm12 }
 0x360   : > { %v659_v55 = vmul.f32 %v1020_v52, %v658_v54  ;;  %v656_v56 = vsel %vm655_vm11, %v1018_v46, %v652_v53 }
 0x361   : > { %v667_v59 = vmul.f32 %v656_v56, %v633_v0 }
 0x362   : > { %v660_v57 = vmul.f32 0.5, %v659_v55 }
 0x363   : > { %v672_v63 = vmul.f32 %v1003_v10, %v667_v59 }
 0x364   : > { %v661_v58 = vsub.f32 1.5, %v660_v57 }
 0x365   : > { %v677_v4 = vadd.f32 %v1004_v1, %v672_v63 }
 0x366   : > { %v662_v60 = vmul.f32 %v1020_v52, %v661_v58 }
 0x368   : > { %v666_v61 = vsel %vm665_vm14, %v1020_v52, %v662_v60 }
 0x369   : > { %v668_v62 = vmul.f32 %v666_v61, %v634_v37 }
 0x36b   : > { %v673_v3 = vmul.f32 %v1003_v10, %v668_v62 }
 0x36d   : > { %v678_v5 = vadd.f32 %v1004_v1, %v673_v3 }
 0x36f   : > { %v679_v6 = vpack.c.bf16 %v678_v5, %v677_v4 }
 0x371   : > { %903 = vmatmul.msk.bf16.vlgmr.msra.gmra.mxu2 %vm476_vm0, %v679_v6 }
 0x3f4   : > { %v707_v17 = vpop.f32.mrf.mxu2 }
 0x3f5   : > { %v708_v18 = vadd.f32 %v1005_v15, %v707_v17 }
 0x3f7   : > { %v712_v19 = vmul.f32 %v708_v18, %v708_v18 }
 0x3f9   : > { %v714_v20 = vmul.f32 %v712_v19, %v708_v18 }
 0x3fb   : > { %v716_v21 = vmul.f32 0.044715, %v714_v20 }
 0x3fc   : > { %v709_v22 = vpop.f32.mrf.mxu2 }
 0x3fd   : > { %v718_v23 = vadd.f32 %v716_v21, %v708_v18  ;;  %v710_v25 = vadd.f32 %v1005_v15, %v709_v22 }
 0x3ff   : > { %v713_v26 = vmul.f32 %v710_v25, %v710_v25  ;;  %v720_v27 = vmul.f32 0.7978846, %v718_v23 }
 0x401   : > { %v715_v28 = vmul.f32 %v713_v26, %v710_v25  ;;  %1021 = vtanh.f32 %v720_v27 }
 0x403   : > { %v717_v30 = vmul.f32 0.044715, %v715_v28 }
 0x405   : > { %v719_v31 = vadd.f32 %v717_v30, %v710_v25 }
 0x407   : > { %v721_v32 = vmul.f32 0.7978846, %v719_v31  ;;  %v1022_v0 = vpop.eup %1021 }
 0x408   : > { %v724_v33 = vadd.f32 1.0, %v1022_v0 }
 0x409   : > { %1023 = vtanh.f32 %v721_v32 }
 0x40a   : > { %v726_v36 = vmul.f32 0.5, %v724_v33 }
 0x40c   : > { %v728_v2 = vmul.f32 %v726_v36, %v708_v18 }
 0x40f   : > { %v1024_v34 = vpop.eup %1023 }
 0x410   : > { %v725_v35 = vadd.f32 1.0, %v1024_v34 }
 0x412   : > { %v727_v37 = vmul.f32 0.5, %v725_v35 }
 0x414   : > { %v729_v38 = vmul.f32 %v727_v37, %v710_v25 }
 0x416   : > { %v730_v39 = vpack.c.bf16 %v729_v38, %v728_v2 }
 0x418   : > { %790 = vmatmul.bf16.vlgmr.msra.gmra.mxu3 %v730_v39 }
 0x49b   : > { %v791_v41 = vpop.f32.mrf.mxu3 }
 0x49c   : > { %v792_v42 = vadd.f32 %v1006_v40, %v791_v41 }
 0x49e   : > { %v796_v43 = vadd.f32 %v792_v42, %v1261_v24 }
 0x4a0   : > { %798 = vst.msk [vmem:[%s433_s23] sm:$0xff] %vm476_vm0, %v796_v43 }
 0x4a3   : > { %v793_v44 = vpop.f32.mrf.mxu3 }
 0x4a4   : > { %v794_v45 = vadd.f32 %v1006_v40, %v793_v44 }
 0x4a6   : > { %v797_v46 = vadd.f32 %v794_v45, %v1266_v29 }
 0x4a8   : > { %799 = vst.msk [vmem:[%s433_s23 + $0x8] sm:$0xff] %vm476_vm0, %v797_v46 }
 0x4a9   : > { %1052 = shalt.err (!%p1049_p3)
}
 0x4aa   : > { %s1091_s0 = smov 128   ;;  %s1092_s23 = smov 8  }
 0x4ab   : > { %955 = dma.vmem_to_hbm [thread:$0]  (%p1201_p5), %s814_s24, 256, %s816_s2, %s801_s29, %s1091_s0, %s1091_s0, %s1092_s23  }
 0x4ac PF: > { %p961_p4 = scmp.ge.s32.totalorder %s1087_s28, 2  ;;  %s830_s15 = sand.u32 1, %s1075_s25  }
 0x4ad   : > { %s831_s16 = scalar_lea.sflag [#allocation3], %s830_s15 }
 0x4ae   : > { %p958_p7 = pnand %p961_p4, %p1205_p6 }
 0x4b0   : > { %p959_p8 = pneg %p958_p7 }
 0x4b2   : > { %1070 = dma.done.wait (%p959_p8), %s831_s16, 256  }
 0x4b3   : > { %1072 = vsyncadd (%p959_p8), %s831_s16, 4294967040  ;;  %p23_p9 = scmp.ge.s32.totalorder %s1188_s14, 4   ;;  %s1379_s25 = smov %s1079_s26 }
 0x4b4   : > { %s1380_s26 = smov %s1083_s27  ;;  %s1381_s27 = smov %s1199_s17 }
 0x4b5   : > { %s1382_s28 = smov %s1188_s14  ;;  %25 = sbr.rel (!%p23_p9) target bundleno = 7 (0x7), region = 107 }
 0x4ba   :  { %837 = vsyncpa [#allocation3], 1 }
 0x4bb   :  { %839 = vsyncpa [#allocation3 + $0x1], 1 }

// kernel: tpu_custom_call.1
= control target key start
LH: loop header
LB: loop body
LE: loop exit
PB: predicated region body
PF: predicated region fallthrough
CT: control target
= control target key end

     0   :  { %s1357_s0 = inlined_call_operand.vmem [shape: f32[2,16,32], index: 0, kind: input, shape index: {}]   ;;  %s1358_s1 = inlined_call_operand.vmem [shape: f32[1,32], index: 1, kind: input, shape index: {}]   ;;  %s1359_s2 = inlined_call_operand.vmem [shape: f32[1,32], index: 2, kind: input, shape index: {}]   ;;  %s1360_s3 = inlined_call_operand.vmem [shape: bf16[16,16], index: 3, kind: input, shape index: {}]   ;;  %s1361_s4 = inlined_call_operand.vmem [shape: f32[16,1], index: 4, kind: input, shape index: {}]   ;;  %s1362_s5 = inlined_call_operand.vmem [shape: bf16[16,16], index: 5, kind: input, shape index: {}]   ;;  %s1363_s6 = inlined_call_operand.vmem [shape: f32[16,1], index: 6, kind: input, shape index: {}]   ;;  %s1364_s7 = inlined_call_operand.vmem [shape: f32[1,32], index: 7, kind: input, shape index: {}]   ;;  %s1365_s8 = inlined_call_operand.vmem [shape: f32[1,32], index: 8, kind: input, shape index: {}]   ;;  %s1366_s9 = inlined_call_operand.vmem [shape: bf16[32,128], index: 9, kind: input, shape index: {}]   ;;  %s1367_s10 = inlined_call_operand.vmem [shape: f32[1,128], index: 10, kind: input, shape index: {}]   ;;  %s1368_s11 = inlined_call_operand.vmem [shape: bf16[128,32], index: 11, kind: input, shape index: {}]   ;;  %s1369_s12 = inlined_call_operand.vmem [shape: f32[1,32], index: 12, kind: input, shape index: {}]   ;;  %s1370_s13 = inlined_call_operand.hbm [shape: f32[2,16,32], index: 13, kind: output, shape index: {}]  }
   0x1   :  { %1371 = sst [smem:[#allocation5_spill]] %s1357_s0 }
   0x2   :  { %1372 = sst [smem:[#allocation6_spill]] %s1358_s1 }
   0x3   :  { %1373 = sst [smem:[#allocation7_spill]] %s1359_s2 }
   0x4   :  { %18 = vsyncpa [#allocation3], 0 }
   0x5   :  { %20 = vsyncpa [#allocation3 + $0x1], 0  ;;  %s1163_s25 = smov 0   ;;  %s1165_s26 = smov 0  }
   0x6   :  { %s1167_s27 = smov 0   ;;  %s1169_s28 = smov 0  }
   0x7 LB: > { %s1184_s29 = sadd.s32 4294967295, %s1087_s28   ;;  %s878_s30 = sadd.s32 4294967294, %s1087_s28   ;;  %s1087_s28 = sphi %s1169_s28, %s1382_s28   ;;  %s1083_s27 = sphi %s1167_s27, %s1381_s27   ;;  %s1079_s26 = sphi %s1165_s26, %s1380_s26   ;;  %s1075_s25 = sphi %s1163_s25, %s1379_s25  }
   0x8   : > { %s1188_s14 = sadd.s32 1, %s1087_s28   ;;  %s311_s15 = sadd.s32 1, %s1083_s27 }
   0x9   : > { %s308_s16 = ssub.s32 %s1087_s28, %s1188_s14  ;;  %p321_p0 = scmp.ne.s32.totalorder %s1083_s27, %s1079_s26 }
   0xa   : > { %p309_p1 = scmp.eq.s32.totalorder %s308_s16, 0  ;;  %p322_p2 = scmp.eq.s32.totalorder %s1184_s29, 1 }
   0xb   : > { %p327_p3 = scmp.ne.s32.totalorder %s1079_s26, %s1075_s25  ;;  %p328_p4 = scmp.eq.s32.totalorder %s878_s30, 1 }
   0xc   : > { %s1199_s17 = scalar_select %p309_p1, %s1083_s27, %s311_s15  }
   0xd   : > { %p1201_p5 = por %p322_p2, %p321_p0  ;;  %p1205_p6 = por %p328_p4, %p327_p3 }
   0xe   : > { %p881_p7 = scmp.ge.s32.totalorder %s1087_s28, 1  ;;  %p390_p8 = scmp.lt.s32.totalorder %s1087_s28, 3 }
  0x10   : > { %p391_p9 = pnand %p881_p7, %p390_p8 }
  0x11   : > { %p434_p10 = scmp.lt.s32.totalorder (!%p391_p9), %s1184_s29, 1  ;;  %s1376_s0 = sld [smem:[#allocation5_spill]] (!%p391_p9) }
  0x12   : > { %394 = sbr.rel (%p391_p9) target bundleno = 1196 (0x4ac), region = 72  ;;  %s1377_s1 = sld [smem:[#allocation6_spill]] (!%p391_p9) }
  0x13   : > { %s1378_s2 = sld [smem:[#allocation7_spill]] (!%p391_p9)  ;;  %s954_s16 = sshll.u32 (!%p391_p9), %s1184_s29, 4 }
  0x14   : > { %s812_s22 = scalar_lea.hbm (!%p391_p9), %s1370_s13, %s954_s16 }
  0x17   : > { %s435_s20 = scalar_select %p434_p10, %s1184_s29, 1  ;;  %vm476_vm0 = vcmask 261120   ;;  %v1089_v4 = vmov 32.0   ;;  %v446_v26 = vld [vmem:[%s1361_s4] sm:$0xff]  ;;  %v1090_v29 = vmov 0   ;;  %v447_v33 = vld [vmem:[%s1361_s4 + $0x8] sm:$0xff] }
  0x18   : > { %1007 = vrcp.f32 %v1089_v4  ;;  %998 = vset.pattern.permute.xlu2 %v1090_v29  ;;  %999 = vset.pattern.permute.xlu0 %v1090_v29  ;;  %v1001_v43 = vld [vmem:[%s1377_s1] ss:$0 sm:$0xff]  ;;  %vm554_vm8 = vcmask 130048   ;;  %v451_v61 = vld [vmem:[%s1363_s6 + $0x8] sm:$0xff] }
  0x19   : > { %s941_s21 = sshll.u32 %s435_s20, 4  ;;  %541 = vperm.xlu2 %998, %v446_v26   ;;  %1000 = vset.pattern.permute.xlu1 %v1090_v29  ;;  %v1002_v48 = vld [vmem:[%s1378_s2] ss:$0 sm:$0xff]  ;;  %s815_s2 = sshll.u32 %s812_s22, 4  ;;  %s816_s2 = int_to_ptr.hbm [resolvable:$true] %s815_s2 }
  0x1a   : > { %s438_s24 = scalar_lea.vmem %s1376_s0, %s941_s21  ;;  %v942_v53 = vld [vmem:[%s1360_s3] sm:$0xff]  ;;  %s431_s0 = sand.u32 1, %s1079_s26  }
  0x1b   : > { %v1216_v0 = vld [vmem:[%s438_s24] sm:$0xff]  ;;  %v1220_v2 = vld [vmem:[%s438_s24 + $0x8] sm:$0xff]  ;;  %s882_s15 = sshll.u32 %s431_s0, 4  ;;  %s801_s29 = scalar_lea.sflag [#allocation3], %s431_s0 }
  0x1c   : > { %v477_v1 = vsel %vm476_vm0, %v1216_v0, 0.0  ;;  %v480_v3 = vsel %vm476_vm0, %v1220_v2, 0.0  ;;  %v450_v60 = vld [vmem:[%s1363_s6] sm:$0xff]  ;;  %s433_s23 = scalar_lea.vmem [#allocation2], %s882_s15  ;;  %s1039_s1 = sshra.s32 %s816_s2, 4  ;;  %s1040_s1 = int_to_ptr.hbm [resolvable:$true] %s1039_s1 }
  0x1d   : > { %478 = vadd.xlane.f32.xlu0 %v477_v1  ;;  %s813_s24 = sshll.u32 %s433_s23, 4  ;;  %s1041_s30 = scalar_lea.hbm %s1040_s1, 16  ;;  %s814_s24 = int_to_ptr.vmem [resolvable:$true] %s813_s24 }
  0x1e   : > { %v1008_v5 = vpop.eup %1007  ;;  %p1042_p11 = scmp.ne.s32.totalorder %s1040_s1, %s1041_s30  ;;  %s1045_s20 = scalar_lea.hbm %s1370_s13, 32 }
  0x1f   : > { %v484_v6 = vmul.f32 32.0, %v1008_v5  ;;  %vm488_vm1 = vweird.f32 %v1008_v5  ;;  %p1046_p0 = scmp.lt.s32.totalorder %s1040_s1, %s1370_s13  ;;  %p1047_p1 = scmp.lt.s32.totalorder %s1045_s20, %s1041_s30 }
  0x20   : > { %p1043_p12 = pnand %p1042_p11, %p1201_p5 }
  0x21   : > { %v485_v7 = vsub.f32 1.0, %v484_v6  ;;  %546 = vperm.xlu2 %998, %v447_v33   ;;  %p1048_p2 = por %p1047_p1, %p1046_p0 }
  0x22   : > { %p1044_p13 = pneg %p1043_p12 }
  0x23   : > { %v486_v8 = vmul.f32 %v1008_v5, %v485_v7 }
  0x24   : > { %p1049_p3 = pnand %p1048_p2, %p1044_p13 }
  0x25   : > { %481 = vadd.xlane.f32.xlu0 %v480_v3  ;;  %v487_v9 = vadd.f32 %v1008_v5, %v486_v8 }
  0x27   : > { %v1224_v10 = vsel %vm488_vm1, %v1008_v5, %v487_v9 }
  0x39   : > { %593 = vperm.xlu0 %999, %v450_v60  }
  0x73   : > { %v542_v54 = vpop.permute.xlu2 %541 }
  0x7b   : > { %v547_v62 = vpop.permute.xlu2 %546 }
  0x90   : > { %v479_v11 = vpop.xlane.xlu0 %478 }
  0x91   : > { %v490_v12 = vmul.f32 %v1224_v10, %v479_v11 }
  0x93   : > { %v492_v13 = vsub.f32 %v1216_v0, %v490_v12 }
  0x95   : > { %v494_v14 = vmul.f32 %v492_v13, %v492_v13 }
  0x97   : > { %v496_v15 = vsel %vm476_vm0, %v494_v14, 0.0 }
  0x98   : > { %497 = vadd.xlane.f32.xlu1 %v496_v15  ;;  %v482_v16 = vpop.xlane.xlu0 %481 }
  0x99   : > { %v491_v17 = vmul.f32 %v1224_v10, %v482_v16 }
  0x9b   : > { %v493_v18 = vsub.f32 %v1220_v2, %v491_v17 }
  0x9d   : > { %v495_v19 = vmul.f32 %v493_v18, %v493_v18 }
  0x9f   : > { %v499_v20 = vsel %vm476_vm0, %v495_v19, 0.0 }
  0xa0   : > { %500 = vadd.xlane.f32.xlu1 %v499_v20  ;;  %v943_v20 = vld [vmem:[%s1362_s5] sm:$0xff] }
  0xb9   : > { %598 = vperm.xlu1 %1000, %v451_v61  }
 0x10b   : > { %v498_v21 = vpop.xlane.xlu1 %497 }
 0x10c   : > { %v502_v22 = vmul.f32 %v498_v21, %v1224_v10  ;;  %v594_v21 = vpop.permute.xlu0 %593 }
 0x10e   : > { %v504_v23 = vadd.f32 1e-06, %v502_v22 }
 0x110   : > { %1009 = vrsqrt.f32 %v504_v23  ;;  %vm512_vm3 = vweird.f32 %v504_v23 }
 0x113   : > { %v501_v24 = vpop.xlane.xlu1 %500 }
 0x114   : > { %v503_v25 = vmul.f32 %v501_v24, %v1224_v10 }
 0x116   : > { %v1010_v27 = vpop.eup %1009  ;;  %v505_v28 = vadd.f32 1e-06, %v503_v25 }
 0x117   : > { %v507_v30 = vmul.f32 %v1010_v27, %v504_v23  ;;  %vm513_vm2 = vweird.f32 %v1010_v27 }
 0x118   : > { %1011 = vrsqrt.f32 %v505_v28  ;;  %vm514_vm4 = vmor %vm512_vm3, %vm513_vm2  ;;  %vm522_vm6 = vweird.f32 %v505_v28 }
 0x119   : > { %v508_v31 = vmul.f32 %v1010_v27, %v507_v30 }
 0x11b   : > { %v509_v32 = vmul.f32 0.5, %v508_v31 }
 0x11d   : > { %v510_v34 = vsub.f32 1.5, %v509_v32 }
 0x11e   : > { %v1012_v35 = vpop.eup %1011 }
 0x11f   : > { %v511_v36 = vmul.f32 %v1010_v27, %v510_v34  ;;  %v517_v37 = vmul.f32 %v1012_v35, %v505_v28  ;;  %vm523_vm5 = vweird.f32 %v1012_v35 }
 0x120   : > { %vm524_vm7 = vmor %vm522_vm6, %vm523_vm5 }
 0x121   : > { %v518_v38 = vmul.f32 %v1012_v35, %v517_v37  ;;  %v515_v40 = vsel %vm514_vm4, %v1010_v27, %v511_v36 }
 0x122   : > { %v526_v42 = vmul.f32 %v515_v40, %v492_v13 }
 0x123   : > { %v519_v39 = vmul.f32 0.5, %v518_v38 }
 0x124   : > { %v531_v47 = vmul.f32 %v1001_v43, %v526_v42 }
 0x125   : > { %v520_v41 = vsub.f32 1.5, %v519_v39  ;;  %v945_v39 = vld [vmem:[%s1366_s9 + $0x8] sm:$0xff] }
 0x126   : > { %v536_v50 = vadd.f32 %v1002_v48, %v531_v47  ;;  %704 = vmatpush.bf16.msra.mxu2 %v945_v39 }
 0x127   : > { %v521_v44 = vmul.f32 %v1012_v35, %v520_v41  ;;  %v944_v41 = vld [vmem:[%s1366_s9] sm:$0xff] }
 0x129   : > { %v525_v45 = vsel %vm524_vm7, %v1012_v35, %v521_v44 }
 0x12a   : > { %v527_v46 = vmul.f32 %v525_v45, %v493_v18  ;;  %705 = vmatpush.bf16.msra.mxu2 %v944_v41 }
 0x12b   : > { %v599_v26 = vpop.permute.xlu1 %598 }
 0x12c   : > { %v532_v49 = vmul.f32 %v1001_v43, %v527_v46 }
 0x12e   : > { %v537_v51 = vadd.f32 %v1002_v48, %v532_v49 }
 0x130   : > { %v538_v52 = vpack.c.bf16 %v537_v51, %v536_v50 }
 0x132   : > { %565 = vmatpush.bf16.msra.mxu0 %v538_v52 }
 0x135   : > { %889 = vmatmul.msk.bf16.vlgmr.msra.gmra.mxu0 %vm554_vm8, %v942_v53 }
 0x1b2   : > { %v567_v55 = vpop.f32.mrf.mxu0 }
 0x1b3   : > { %v568_v56 = vadd.f32 %v567_v55, %v542_v54 }
 0x1b5   : > { %v572_v57 = vmul.f32 %v568_v56, %v568_v56 }
 0x1b7   : > { %v574_v58 = vmul.f32 %v572_v57, %v568_v56 }
 0x1b9   : > { %v576_v59 = vmul.f32 0.044715, %v574_v58 }
 0x1ba   : > { %v569_v63 = vpop.f32.mrf.mxu0 }
 0x1bb   : > { %v570_v1 = vadd.f32 %v569_v63, %v547_v62  ;;  %v578_v3 = vadd.f32 %v576_v59, %v568_v56 }
 0x1bd   : > { %v573_v4 = vmul.f32 %v570_v1, %v570_v1  ;;  %v580_v5 = vmul.f32 0.7978846, %v578_v3 }
 0x1bf   : > { %v575_v6 = vmul.f32 %v573_v4, %v570_v1  ;;  %1013 = vtanh.f32 %v580_v5 }
 0x1c1   : > { %v577_v7 = vmul.f32 0.044715, %v575_v6 }
 0x1c3   : > { %v579_v8 = vadd.f32 %v577_v7, %v570_v1  ;;  %v953_v7 = vld [vmem:[%s1368_s11 + $0x38] sm:$0xff] }
 0x1c4   : > { %782 = vmatpush.bf16.msra.mxu3 %v953_v7 }
 0x1c5   : > { %v581_v9 = vmul.f32 0.7978846, %v579_v8  ;;  %v1014_v11 = vpop.eup %1013  ;;  %v952_v8 = vld [vmem:[%s1368_s11 + $0x30] sm:$0xff] }
 0x1c6   : > { %v584_v12 = vadd.f32 1.0, %v1014_v11  ;;  %v950_v11 = vld [vmem:[%s1368_s11 + $0x20] sm:$0xff] }
 0x1c7   : > { %1015 = vtanh.f32 %v581_v9  ;;  %v951_v9 = vld [vmem:[%s1368_s11 + $0x28] sm:$0xff] }
 0x1c8   : > { %v586_v15 = vmul.f32 0.5, %v584_v12  ;;  %783 = vmatpush.bf16.msra.mxu3 %v952_v8  ;;  %v949_v12 = vld [vmem:[%s1368_s11 + $0x18] sm:$0xff] }
 0x1ca   : > { %v588_v17 = vmul.f32 %v586_v15, %v568_v56  ;;  %v1005_v15 = vld [vmem:[%s1367_s10] ss:$0 sm:$0xff] }
 0x1cc   : > { %784 = vmatpush.bf16.msra.mxu3 %v951_v9 }
 0x1cd   : > { %v1016_v13 = vpop.eup %1015 }
 0x1ce   : > { %v585_v14 = vadd.f32 1.0, %v1016_v13  ;;  %v948_v13 = vld [vmem:[%s1368_s11 + $0x10] sm:$0xff] }
 0x1d0   : > { %v587_v16 = vmul.f32 0.5, %v585_v14  ;;  %785 = vmatpush.bf16.msra.mxu3 %v950_v11  ;;  %v947_v14 = vld [vmem:[%s1368_s11 + $0x8] sm:$0xff] }
 0x1d2   : > { %v589_v18 = vmul.f32 %v587_v16, %v570_v1  ;;  %v1004_v1 = vld [vmem:[%s1365_s8] ss:$0 sm:$0xff] }
 0x1d3   : > { %v946_v16 = vld [vmem:[%s1368_s11] sm:$0xff] }
 0x1d4   : > { %v590_v19 = vpack.c.bf16 %v589_v18, %v588_v17  ;;  %786 = vmatpush.bf16.msra.mxu3 %v949_v12 }
 0x1d6   : > { %616 = vmatpush.bf16.msra.mxu1 %v590_v19 }
 0x1d8   : > { %787 = vmatpush.bf16.msra.mxu3 %v948_v13 }
 0x1d9   : > { %894 = vmatmul.msk.bf16.vlgmr.msra.gmra.mxu1 %vm554_vm8, %v943_v20 }
 0x1dc   : > { %788 = vmatpush.bf16.msra.mxu3 %v947_v14 }
 0x1e0   : > { %789 = vmatpush.bf16.msra.mxu3 %v946_v16 }
 0x256   : > { %v618_v22 = vpop.f32.mrf.mxu1 }
 0x257   : > { %v619_v23 = vadd.f32 %v618_v22, %v594_v21 }
 0x259   : > { %v1261_v24 = vadd.f32 %v619_v23, %v1216_v0 }
 0x25b   : > { %v625_v25 = vsel %vm476_vm0, %v1261_v24, 0.0 }
 0x25c   : > { %626 = vadd.xlane.f32.xlu2 %v625_v25 }
 0x25e   : > { %v620_v27 = vpop.f32.mrf.mxu1 }
 0x25f   : > { %v621_v28 = vadd.f32 %v620_v27, %v599_v26 }
 0x261   : > { %v1266_v29 = vadd.f32 %v621_v28, %v1220_v2 }
 0x263   : > { %v628_v30 = vsel %vm476_vm0, %v1266_v29, 0.0 }
 0x264   : > { %629 = vadd.xlane.f32.xlu1 %v628_v30 }
 0x2cf   : > { %v627_v31 = vpop.xlane.xlu2 %626 }
 0x2d0   : > { %v631_v32 = vmul.f32 %v627_v31, %v1224_v10 }
 0x2d2   : > { %v633_v0 = vsub.f32 %v1261_v24, %v631_v32 }
 0x2d4   : > { %v635_v33 = vmul.f32 %v633_v0, %v633_v0 }
 0x2d6   : > { %v637_v34 = vsel %vm476_vm0, %v635_v33, 0.0 }
 0x2d7   : > { %v630_v35 = vpop.xlane.xlu1 %629  ;;  %638 = vadd.xlane.f32.xlu0 %v637_v34 }
 0x2d8   : > { %v632_v36 = vmul.f32 %v630_v35, %v1224_v10 }
 0x2da   : > { %v634_v37 = vsub.f32 %v1266_v29, %v632_v36 }
 0x2dc   : > { %v636_v2 = vmul.f32 %v634_v37, %v634_v37 }
 0x2de   : > { %v640_v38 = vsel %vm476_vm0, %v636_v2, 0.0 }
 0x2df   : > { %641 = vadd.xlane.f32.xlu2 %v640_v38 }
 0x34a   : > { %v639_v40 = vpop.xlane.xlu0 %638 }
 0x34b   : > { %v643_v42 = vmul.f32 %v639_v40, %v1224_v10  ;;  %v1006_v40 = vld [vmem:[%s1369_s12] ss:$0 sm:$0xff] }
 0x34d   : > { %v645_v43 = vadd.f32 1e-06, %v643_v42 }
 0x34f   : > { %1017 = vrsqrt.f32 %v645_v43  ;;  %vm653_vm10 = vweird.f32 %v645_v43 }
 0x352   : > { %v642_v44 = vpop.xlane.xlu2 %641 }
 0x353   : > { %v644_v45 = vmul.f32 %v642_v44, %v1224_v10  ;;  %v1003_v10 = vld [vmem:[%s1364_s7] ss:$0 sm:$0xff] }
 0x355   : > { %v1018_v46 = vpop.eup %1017  ;;  %v646_v47 = vadd.f32 1e-06, %v644_v45 }
 0x356   : > { %v648_v48 = vmul.f32 %v1018_v46, %v645_v43  ;;  %vm654_vm9 = vweird.f32 %v1018_v46 }
 0x357   : > { %1019 = vrsqrt.f32 %v646_v47  ;;  %vm655_vm11 = vmor %vm653_vm10, %vm654_vm9  ;;  %vm663_vm13 = vweird.f32 %v646_v47 }
 0x358   : > { %v649_v49 = vmul.f32 %v1018_v46, %v648_v48 }
 0x35a   : > { %v650_v50 = vmul.f32 0.5, %v649_v49 }
 0x35c   : > { %v651_v51 = vsub.f32 1.5, %v650_v50 }
 0x35d   : > { %v1020_v52 = vpop.eup %1019 }
 0x35e   : > { %v652_v53 = vmul.f32 %v1018_v46, %v651_v51  ;;  %v658_v54 = vmul.f32 %v1020_v52, %v646_v47  ;;  %vm664_vm12 = vweird.f32 %v1020_v52 }
 0x35f   : > { %vm665_vm14 = vmor %vm663_vm13, %vm664_vm12 }
 0x360   : > { %v659_v55 = vmul.f32 %v1020_v52, %v658_v54  ;;  %v656_v56 = vsel %vm655_vm11, %v1018_v46, %v652_v53 }
 0x361   : > { %v667_v59 = vmul.f32 %v656_v56, %v633_v0 }
 0x362   : > { %v660_v57 = vmul.f32 0.5, %v659_v55 }
 0x363   : > { %v672_v63 = vmul.f32 %v1003_v10, %v667_v59 }
 0x364   : > { %v661_v58 = vsub.f32 1.5, %v660_v57 }
 0x365   : > { %v677_v4 = vadd.f32 %v1004_v1, %v672_v63 }
 0x366   : > { %v662_v60 = vmul.f32 %v1020_v52, %v661_v58 }
 0x368   : > { %v666_v61 = vsel %vm665_vm14, %v1020_v52, %v662_v60 }
 0x369   : > { %v668_v62 = vmul.f32 %v666_v61, %v634_v37 }
 0x36b   : > { %v673_v3 = vmul.f32 %v1003_v10, %v668_v62 }
 0x36d   : > { %v678_v5 = vadd.f32 %v1004_v1, %v673_v3 }
 0x36f   : > { %v679_v6 = vpack.c.bf16 %v678_v5, %v677_v4 }
 0x371   : > { %903 = vmatmul.msk.bf16.vlgmr.msra.gmra.mxu2 %vm476_vm0, %v679_v6 }
 0x3f4   : > { %v707_v17 = vpop.f32.mrf.mxu2 }
 0x3f5   : > { %v708_v18 = vadd.f32 %v1005_v15, %v707_v17 }
 0x3f7   : > { %v712_v19 = vmul.f32 %v708_v18, %v708_v18 }
 0x3f9   : > { %v714_v20 = vmul.f32 %v712_v19, %v708_v18 }
 0x3fb   : > { %v716_v21 = vmul.f32 0.044715, %v714_v20 }
 0x3fc   : > { %v709_v22 = vpop.f32.mrf.mxu2 }
 0x3fd   : > { %v718_v23 = vadd.f32 %v716_v21, %v708_v18  ;;  %v710_v25 = vadd.f32 %v1005_v15, %v709_v22 }
 0x3ff   : > { %v713_v26 = vmul.f32 %v710_v25, %v710_v25  ;;  %v720_v27 = vmul.f32 0.7978846, %v718_v23 }
 0x401   : > { %v715_v28 = vmul.f32 %v713_v26, %v710_v25  ;;  %1021 = vtanh.f32 %v720_v27 }
 0x403   : > { %v717_v30 = vmul.f32 0.044715, %v715_v28 }
 0x405   : > { %v719_v31 = vadd.f32 %v717_v30, %v710_v25 }
 0x407   : > { %v721_v32 = vmul.f32 0.7978846, %v719_v31  ;;  %v1022_v0 = vpop.eup %1021 }
 0x408   : > { %v724_v33 = vadd.f32 1.0, %v1022_v0 }
 0x409   : > { %1023 = vtanh.f32 %v721_v32 }
 0x40a   : > { %v726_v36 = vmul.f32 0.5, %v724_v33 }
 0x40c   : > { %v728_v2 = vmul.f32 %v726_v36, %v708_v18 }
 0x40f   : > { %v1024_v34 = vpop.eup %1023 }
 0x410   : > { %v725_v35 = vadd.f32 1.0, %v1024_v34 }
 0x412   : > { %v727_v37 = vmul.f32 0.5, %v725_v35 }
 0x414   : > { %v729_v38 = vmul.f32 %v727_v37, %v710_v25 }
 0x416   : > { %v730_v39 = vpack.c.bf16 %v729_v38, %v728_v2 }
 0x418   : > { %790 = vmatmul.bf16.vlgmr.msra.gmra.mxu3 %v730_v39 }
 0x49b   : > { %v791_v41 = vpop.f32.mrf.mxu3 }
 0x49c   : > { %v792_v42 = vadd.f32 %v1006_v40, %v791_v41 }
 0x49e   : > { %v796_v43 = vadd.f32 %v792_v42, %v1261_v24 }
 0x4a0   : > { %798 = vst.msk [vmem:[%s433_s23] sm:$0xff] %vm476_vm0, %v796_v43 }
 0x4a3   : > { %v793_v44 = vpop.f32.mrf.mxu3 }
 0x4a4   : > { %v794_v45 = vadd.f32 %v1006_v40, %v793_v44 }
 0x4a6   : > { %v797_v46 = vadd.f32 %v794_v45, %v1266_v29 }
 0x4a8   : > { %799 = vst.msk [vmem:[%s433_s23 + $0x8] sm:$0xff] %vm476_vm0, %v797_v46 }
 0x4a9   : > { %1052 = shalt.err (!%p1049_p3)
}
 0x4aa   : > { %s1091_s0 = smov 128   ;;  %s1092_s23 = smov 8  }
 0x4ab   : > { %955 = dma.vmem_to_hbm [thread:$0]  (%p1201_p5), %s814_s24, 256, %s816_s2, %s801_s29, %s1091_s0, %s1091_s0, %s1092_s23  }
 0x4ac PF: > { %p961_p4 = scmp.ge.s32.totalorder %s1087_s28, 2  ;;  %s830_s15 = sand.u32 1, %s1075_s25  }
 0x4ad   : > { %s831_s16 = scalar_lea.sflag [#allocation3], %s830_s15 }
 0x4ae   : > { %p958_p7 = pnand %p961_p4, %p1205_p6 }
 0x4b0   : > { %p959_p8 = pneg %p958_p7 }
 0x4b2   : > { %1070 = dma.done.wait (%p959_p8), %s831_s16, 256  }
 0x4b3   : > { %1072 = vsyncadd (%p959_p8), %s831_s16, 4294967040  ;;  %p23_p9 = scmp.ge.s32.totalorder %s1188_s14, 4   ;;  %s1379_s25 = smov %s1079_s26 }
 0x4b4   : > { %s1380_s26 = smov %s1083_s27  ;;  %s1381_s27 = smov %s1199_s17 }
 0x4b5   : > { %s1382_s28 = smov %s1188_s14  ;;  %25 = sbr.rel (!%p23_p9) target bundleno = 7 (0x7), region = 107 }
 0x4ba   :  { %837 = vsyncpa [#allocation3], 1 }
 0x4bb   :  { %839 = vsyncpa [#allocation3 + $0x1], 1 }

</bundles_post_ra>
